<compile_context>
chip_gen: v5e
topology: v5e:2x2
jax: 0.10.0
libtpu: 0.0.40
codegen_flags: <defaults>
</compile_context>

<pallas_src>
import functools
import numpy as np
import jax
import jax.numpy as jnp
from jax.experimental import pallas as pl
from jax.experimental.pallas import tpu as pltpu

# ----------------------------------------------------------------------------
# Clifford algebra Cl(3,0,0) static tables
# ----------------------------------------------------------------------------
BLADES = [(), (0,), (1,), (2,), (0, 1), (0, 2), (1, 2), (0, 1, 2)]
BLADE_BITS = [sum(1 << i for i in b) for b in BLADES]
BLADE_OF_BITS = {m: i for i, m in enumerate(BLADE_BITS)}
GRADE_OF_BLADE = np.array([len(b) for b in BLADES], np.int32)  # [0,1,1,1,2,2,2,3]


def _reorder_sign(a, b):
    a >>= 1
    s = 0
    while a:
        s += bin(a & b).count("1")
        a >>= 1
    return -1.0 if (s & 1) else 1.0


def build_cayley():
    cay = np.zeros((8, 8, 8), np.float32)
    for i, abits in enumerate(BLADE_BITS):
        for k, bbits in enumerate(BLADE_BITS):
            j = BLADE_OF_BITS[abits ^ bbits]
            cay[i, j, k] = _reorder_sign(abits, bbits)  # metric (1,1,1): e_i^2 = +1
    return cay


CAYLEY = build_cayley()


def build_static_mats(C):
    """Static operators acting on channel-major flat multivectors (C*8 wide).

    Geometric product factorization: gp = ((x@ext) * (y@cayc)) @ summ, where summ
    is a plain sum over the 8 blade blocks. In the kernels, ext/cayc are folded
    into the MVLinear weights host-side and summ becomes an in-kernel slab-sum.
    """
    C8 = C * 8
    ext = np.zeros((C8, 8 * C8), np.float32)
    cayc = np.zeros((C8, 8 * C8), np.float32)
    for i in range(8):
        off = i * C8
        for c in range(C):
            for b in range(8):
                ext[c * 8 + i, off + c * 8 + b] = 1.0
            for k in range(8):
                for j in range(8):
                    cayc[c * 8 + k, off + c * 8 + j] = CAYLEY[i, j, k]
    # repeat_interleave over subspaces (1,3,3,1): (C*4) -> (C*8)
    rexp = np.zeros((C * 4, C8), np.float32)
    for c in range(C):
        for b in range(8):
            rexp[c * 4 + GRADE_OF_BLADE[b], c * 8 + b] = 1.0
    # per-channel blade pooling: (C*8) -> (C)
    psum = np.zeros((C8, C), np.float32)
    for c in range(C):
        psum[c * 8:(c + 1) * 8, c] = 1.0
    return {
        "ext": jnp.asarray(ext),
        "cayc": jnp.asarray(cayc),
        "rexp": jnp.asarray(rexp),
        "psum": jnp.asarray(psum),
    }


# ----------------------------------------------------------------------------
# Parameter construction (deterministic, synthetic)
# ----------------------------------------------------------------------------
def init_linear(key, din, dout, scale=0.1):
    kw, kb = jax.random.split(key)
    w = scale * jax.random.normal(kw, (din, dout), jnp.float32)
    b = scale * jax.random.normal(kb, (1, dout), jnp.float32)
    return w, b


def init_mvlinear_subspace(key, cin, cout, scale=0.1):
    """MVLinear(subspaces=True, bias=True): weight (cout,cin,4), bias at blade 0.
    Expanded to a (cin*8, cout*8) matrix on the flat layout + flat bias (1, cout*8)."""
    kw, kb = jax.random.split(key)
    w = scale * jax.random.normal(kw, (cout, cin, 4), jnp.float32)
    b = scale * jax.random.normal(kb, (cout,), jnp.float32)
    w_exp = w[:, :, GRADE_OF_BLADE]                                  # (cout,cin,8)
    big = jnp.einsum("ocb,bd->cbod", w_exp, jnp.eye(8, dtype=jnp.float32))
    big = big.reshape(cin * 8, cout * 8)
    b_flat = jnp.zeros((1, cout * 8), jnp.float32).at[0, jnp.arange(cout) * 8].set(b)
    return big, b_flat


def init_block(key, S, C):
    keys = jax.random.split(key, 10)
    p = {}
    p["w1"], p["b1"] = init_linear(keys[0], 2 * S + C, S)      # message_net[0]
    p["w2"], p["b2"] = init_linear(keys[1], S, S)              # message_net[2]
    p["wu1"], p["bu1"] = init_linear(keys[2], 2 * S, S)        # update_net[0]
    p["wu2"], p["bu2"] = init_linear(keys[3], S, S)            # update_net[2]
    p["wp1"], p["bp1"] = init_linear(keys[4], S, S)            # pos_net[0]
    p["wp2"], p["bp2"] = init_linear(keys[5], S, 4 * C)        # pos_net[2]
    p["wv_big"], p["bv_flat"] = init_mvlinear_subspace(keys[6], C, C)       # self.v
    p["wl_big"], p["bl_flat"] = init_mvlinear_subspace(keys[7], C, C)       # linear_left
    p["wr_big"], p["br_flat"] = init_mvlinear_subspace(keys[8], C, C)       # linear_right
    p["wo_big"], p["bo_flat"] = init_mvlinear_subspace(keys[9], 2 * C, C)   # linear_out
    p["a_rep"] = jnp.repeat(jnp.ones((C,), jnp.float32), 8)[None, :]        # MVLayerNorm a
    # note: self.s_layernorm exists in __init__ but is unused in the PyTorch forward.
    return p


def init_model(key, S, C, num_layers, in_features=2, out_features=1):
    keys = jax.random.split(key, num_layers + 3)
    params = {"S": S, "C": C}
    kf1, kf2 = jax.random.split(keys[0])
    params["femb_w"] = 0.1 * jax.random.normal(kf1, (C, in_features), jnp.float32)
    params["femb_b"] = 0.1 * jax.random.normal(kf2, (C,), jnp.float32)
    params["inv_w"], params["inv_b"] = init_linear(keys[1], 1, S)
    kp1, kp2 = jax.random.split(keys[2])
    params["proj_w"] = 0.1 * jax.random.normal(kp1, (out_features, C), jnp.float32)
    params["proj_b"] = 0.1 * jax.random.normal(kp2, (out_features,), jnp.float32)
    params["layers"] = [init_block(keys[3 + i], S, C) for i in range(num_layers)]
    return params


# ----------------------------------------------------------------------------
# Small helpers
# ----------------------------------------------------------------------------
def _ru128(n):
    return ((n + 127) // 128) * 128


def _pick_tile(rows, cap):
    """Largest multiple-of-16 row tile <= cap that still yields >= 2 grid steps
    when rows allow (keeps both v7x TensorCores busy). Sweep `cap` when tuning."""
    half = (rows + 1) // 2
    t = ((half + 15) // 16) * 16
    return int(max(16, min(cap, t)))


def _pad_rows(x, mult):
    npad = (-x.shape[0]) % mult
    if npad:
        x = jnp.pad(x, ((0, npad), (0, 0)))
    return x


def _pad_cols(x, width):
    npad = width - x.shape[1]
    if npad:
        x = jnp.pad(x, ((0, 0), (0, npad)))
    return x


def _full_spec(shape):
    return pl.BlockSpec(shape, lambda *_: (0,) * len(shape))


def _pack_bias_rows(rows):
    """Stack 1-row biases into (n_rows, W) with 128-aligned rows so every in-kernel
    bias slice starts at lane 0 of its own (sublane) row."""
    w = max(128, _ru128(max(int(r.shape[-1]) for r in rows)))
    out = [jnp.pad(r.reshape(1, -1), ((0, 0), (0, w - r.shape[-1]))) for r in rows]
    return jnp.concatenate(out, axis=0).astype(jnp.float32)


def _cost(rows, weight_shapes, inputs, out_bytes, transcendentals=0):
    flops = 2 * rows * sum(int(a) * int(b) for a, b in weight_shapes)
    bytes_accessed = int(sum(int(x.size) * x.dtype.itemsize for x in inputs)) + int(out_bytes)
    return pl.CostEstimate(flops=int(flops), transcendentals=int(transcendentals),
                           bytes_accessed=bytes_accessed)


# ----------------------------------------------------------------------------
# Host-side weight folding (exact rearrangements, done once per layer)
# ----------------------------------------------------------------------------
def prepare_layer(p, mats, S, C):
    bf16 = jnp.bfloat16
    ext, cayc, rexp, psum = mats["ext"], mats["cayc"], mats["rexp"], mats["psum"]
    d = {}
    # ---- edge kernel ----
    w1 = p["w1"]                                                     # (2S + C, S)
    # edge_attr@w1e == (v_ij^2)@(psum@w1e): fold psum into w1's edge-attr rows.
    d["e_w1"] = jnp.concatenate([w1[:2 * S], psum @ w1[2 * S:]], axis=0).astype(bf16)
    d["e_wv"] = p["wv_big"].astype(bf16)
    d["e_w2"] = p["w2"].astype(bf16)
    d["e_wp1"] = p["wp1"].astype(bf16)
    d["e_wp2"] = (p["wp2"] @ rexp).astype(bf16)                      # fold repeat_interleave
    d["e_bias"] = _pack_bias_rows(
        [p["bv_flat"], p["b1"], p["b2"], p["bp1"], p["bp2"] @ rexp])
    # ---- node kernel ----
    d["n_wu1"] = p["wu1"].astype(bf16)
    d["n_wu2"] = p["wu2"].astype(bf16)
    d["n_wle"] = (p["wl_big"] @ ext).astype(bf16)                    # (C8, 8*C8)
    d["n_wrc"] = (p["wr_big"] @ cayc).astype(bf16)                   # (C8, 8*C8)
    d["n_wo"] = p["wo_big"].astype(bf16)                             # (2*C8, C8)
    d["n_ps"] = psum.astype(bf16)                                    # (C8, C)
    d["n_bias"] = _pack_bias_rows([p["bu1"], p["bu2"], p["bo_flat"], p["a_rep"]])
    d["n_blr"] = _pack_bias_rows([p["bl_flat"] @ ext, p["br_flat"] @ cayc])  # (2, 8*C8)
    return d


# ----------------------------------------------------------------------------
# Pallas kernels
# ----------------------------------------------------------------------------
def _edge_kernel(S, C, OUT_W, in_ref, wv_ref, w1_ref, w2_ref, wp1_ref, wp2_ref,
                 bias_ref, out_ref):
    C8 = 8 * C
    bf16 = jnp.bfloat16
    dotf = lambda a, b: jnp.dot(a, b, preferred_element_type=jnp.float32)

    x = in_ref[...]                                    # bf16 [s_i | s_j | v_diff | pad]
    bv = bias_ref[0:1, 0:C8]
    b1 = bias_ref[1:2, 0:S]
    b2 = bias_ref[2:3, 0:S]
    bp1 = bias_ref[3:4, 0:S]
    bp2 = bias_ref[4:5, 0:C8]

    # v_ij = MVLinear_v(v_j - v_i)   (flat subspace matmul + blade-0 bias)
    v_ij = dotf(x[:, 2 * S:2 * S + C8], wv_ref[...]) + bv            # (T, C8) f32

    # message_net(cat(s_i, s_j, edge_attr)); edge_attr@w1e folded into psum@w1e so
    # the whole first layer is a single K = 2S+C8 matmul on [s_i | s_j | v_ij^2].
    x1 = jnp.concatenate([x[:, 0:2 * S], (v_ij * v_ij).astype(bf16)], axis=-1)
    h = jnp.maximum(dotf(x1, w1_ref[...]) + b1, 0.0)
    msg = dotf(h.astype(bf16), w2_ref[...]) + b2                     # (T, S)

    # pos_net(message); repeat_interleave over subspaces folded into wp2 host-side.
    hp = jnp.maximum(dotf(msg.astype(bf16), wp1_ref[...]) + bp1, 0.0)
    pmsg = v_ij * (dotf(hp.astype(bf16), wp2_ref[...]) + bp2)        # (T, C8)

    # lane-dense packed bf16 output: [msg | pmsg | zero-pad]
    parts = [msg, pmsg]
    if OUT_W > S + C8:
        parts.append(jnp.zeros((msg.shape[0], OUT_W - (S + C8)), jnp.float32))
    out_ref[...] = jnp.concatenate(parts, axis=-1).astype(out_ref.dtype)


def _node_kernel(S, C, OUT_W, a_ref, b_ref, wu1_ref, wu2_ref, wle_ref, wrc_ref,
                 wo_ref, ps_ref, bias_ref, blr_ref, out_ref):
    C8 = 8 * C
    bf16 = jnp.bfloat16
    dotf = lambda a, b: jnp.dot(a, b, preferred_element_type=jnp.float32)

    a = a_ref[...]                        # f32 state [s | v | pad]   (residual path)
    b = b_ref[...]                        # bf16 [s | msg_aggr | pos_msg_aggr | pad]
    s = a[:, 0:S]
    v = a[:, S:S + C8]
    pm = b[:, 2 * S:2 * S + C8]           # bf16 pos_message_aggr

    bu1 = bias_ref[0:1, 0:S]
    bu2 = bias_ref[1:2, 0:S]
    bo = bias_ref[2:3, 0:C8]
    a_rep = bias_ref[3:4, 0:C8]
    bl_ext = blr_ref[0:1, :]
    br_cay = blr_ref[1:2, :]

    # scalar update: s + update_net(cat(s, message_aggr)); cat is contiguous in slab B.
    h = jnp.maximum(dotf(b[:, 0:2 * S], wu1_ref[...]) + bu1, 0.0)
    s_out = s + dotf(h.astype(bf16), wu2_ref[...]) + bu2

    # geometric product: linear_left/right with ext/cayc folded into their weights;
    # the old `summ` matmul is replaced by the exact slab-sum over 8 blade blocks.
    vle = dotf(pm, wle_ref[...]) + bl_ext                  # (T, 8*C8) f32
    vrc = dotf(pm, wrc_ref[...]) + br_cay                  # (T, 8*C8) f32
    z = vle * vrc
    w = (z[:, 0:2 * C8] + z[:, 2 * C8:4 * C8]
         + z[:, 4 * C8:6 * C8] + z[:, 6 * C8:8 * C8])
    gp = w[:, 0:C8] + w[:, C8:2 * C8]                      # (T, C8)

    # linear_out(cat([gp, pos_message_aggr])) as one K = 2*C8 matmul.
    vo = dotf(jnp.concatenate([gp.astype(bf16), pm], axis=-1), wo_ref[...]) + bo

    # MVLayerNorm (f32 path): per-channel norm, mean over channels, scale by a.
    q = dotf((vo * vo).astype(bf16), ps_ref[...])          # (T, C)
    norm = jnp.sqrt(jnp.sqrt(q * q + 1e-16))
    nmean = jnp.mean(norm, axis=-1, keepdims=True) + 1e-6
    v_out = a_rep * vo * pl.reciprocal(nmean, approx=True) + v

    parts = [s_out, v_out]
    if OUT_W > S + C8:
        parts.append(jnp.zeros((s_out.shape[0], OUT_W - (S + C8)), jnp.float32))
    out_ref[...] = jnp.concatenate(parts, axis=-1)


# ----------------------------------------------------------------------------
# pallas_call wrappers
# ----------------------------------------------------------------------------
def edge_message(c, e_in, S, C):
    """Per-edge kernel. Input: bf16 slab [s_i|s_j|v_diff]; output: bf16 [msg|pmsg|pad]."""
    E, IN_W = e_in.shape
    C8 = 8 * C
    OUT_W = _ru128(S + C8)
    tile = _pick_tile(E, cap=1024)
    e_p = _pad_rows(e_in, tile)
    Ep = e_p.shape[0]
    weights = (c["e_wv"], c["e_w1"], c["e_w2"], c["e_wp1"], c["e_wp2"], c["e_bias"])
    wshapes = [c["e_wv"].shape, c["e_w1"].shape, c["e_w2"].shape,
               c["e_wp1"].shape, c["e_wp2"].shape]
    ce = _cost(Ep, wshapes, (e_p,) + weights, Ep * OUT_W * 2)
    packed = pl.pallas_call(
        functools.partial(_edge_kernel, S, C, OUT_W),
        grid=(Ep // tile,),
        in_specs=[pl.BlockSpec((tile, IN_W), lambda i: (i, 0))]
                 + [_full_spec(w.shape) for w in weights],
        out_specs=pl.BlockSpec((tile, OUT_W), lambda i: (i, 0)),
        out_shape=jax.ShapeDtypeStruct((Ep, OUT_W), jnp.bfloat16),
        compiler_params=pltpu.CompilerParams(dimension_semantics=("parallel",)),
        cost_estimate=ce,
    )(e_p, *weights)
    return packed[:E]


def node_update(c, state, slab_b, S, C):
    """Per-node kernel. Inputs: f32 state [s|v|pad] and bf16 [s|msg|pm] slabs.
    Output: f32 state [s_out|v_out|pad] (same layout as the input state slab)."""
    N, ST_W = state.shape
    C8 = 8 * C
    IN_W = slab_b.shape[1]
    tile = _pick_tile(N, cap=512)
    a_p = _pad_rows(state, tile)
    b_p = _pad_rows(slab_b, tile)
    Np = a_p.shape[0]
    weights = (c["n_wu1"], c["n_wu2"], c["n_wle"], c["n_wrc"], c["n_wo"],
               c["n_ps"], c["n_bias"], c["n_blr"])
    wshapes = [c["n_wu1"].shape, c["n_wu2"].shape, c["n_wle"].shape,
               c["n_wrc"].shape, c["n_wo"].shape, c["n_ps"].shape]
    ce = _cost(Np, wshapes, (a_p, b_p) + weights, Np * ST_W * 4,
               transcendentals=Np * (2 * C + 1))
    out = pl.pallas_call(
        functools.partial(_node_kernel, S, C, ST_W),
        grid=(Np // tile,),
        in_specs=[pl.BlockSpec((tile, ST_W), lambda i: (i, 0)),
                  pl.BlockSpec((tile, IN_W), lambda i: (i, 0))]
                 + [_full_spec(w.shape) for w in weights],
        out_specs=pl.BlockSpec((tile, ST_W), lambda i: (i, 0)),
        out_shape=jax.ShapeDtypeStruct((Np, ST_W), jnp.float32),
        compiler_params=pltpu.CompilerParams(dimension_semantics=("parallel",)),
        cost_estimate=ce,
    )(a_p, b_p, *weights)
    return out[:N]


# ----------------------------------------------------------------------------
# Full model forward (glue in plain JAX around the two Pallas kernels)
# ----------------------------------------------------------------------------
def _embed_grade1(vec):
    n = vec.shape[0]
    return jnp.concatenate(
        [jnp.zeros((n, 1), vec.dtype), vec, jnp.zeros((n, 4), vec.dtype)], axis=-1)


def nbody_egnn_forward(params, layer_consts, S, C, batch_size, num_nodes,
                       loc, vel, charges, edge_index, y):
    C8 = 8 * C
    BN = batch_size * num_nodes
    IN_W = _ru128(2 * S + C8)      # edge-input / node-slab-B width
    ST_W = _ru128(S + C8)          # state / node-output width

    coords = loc.reshape(batch_size, num_nodes, 3)
    input_pos = coords - coords.mean(axis=1, keepdims=True)

    # inv_feature_embedding: Linear(1, hidden_features)
    s = charges @ params["inv_w"] + params["inv_b"]                     # (BN, S)

    # embed positions / velocities as grade-1 multivectors, stack as 2 channels
    pos_mv = _embed_grade1(input_pos.reshape(BN, 3))
    vel_mv = _embed_grade1(vel)
    x = jnp.stack([pos_mv, vel_mv], axis=1)                             # (BN, 2, 8)

    # feature_embedding: MVLinear(2 -> C, subspaces=False, bias at blade 0)
    x = jnp.einsum("nci,oc->noi", x, params["femb_w"])
    x = x.at[:, :, 0].add(params["femb_b"][None, :])
    v_flat = x.reshape(BN, C8)

    send_idx, rec_idx = edge_index
    # Matches PyTorch reference: num_messages = bincount(send_idx) even though the
    # aggregation target is rec_idx (identical for regular / fully-connected graphs).
    num_messages = jnp.bincount(send_idx, length=BN).astype(jnp.float32)[:, None]
    inv_sqrt_n = 1.0 / jnp.sqrt(num_messages)

    # state slab [s | v | pad] -- exactly the node kernel's output layout.
    state = _pad_cols(jnp.concatenate([s, v_flat], axis=-1), ST_W)

    for lc in layer_consts:
        s_cur = state[:, :S]
        v_cur = state[:, S:S + C8]
        # TODO(synk): fuse the edge gather / segment_sum scatter-add into the kernels
        # (PrefetchScalarGridSpec + DMA gather, or dense (B,N,N) form for fully-
        # connected graphs) to remove these per-layer HBM round-trips.
        e_in = jnp.concatenate(
            [s_cur[send_idx], s_cur[rec_idx], v_cur[rec_idx] - v_cur[send_idx]],
            axis=-1).astype(jnp.bfloat16)
        e_in = _pad_cols(e_in, IN_W)
        packed = edge_message(lc, e_in, S, C)                           # Pallas kernel A
        aggr = jax.ops.segment_sum(packed[:, :S + C8].astype(jnp.float32),
                                   rec_idx, num_segments=BN) * inv_sqrt_n
        slab_b = _pad_cols(jnp.concatenate([s_cur, aggr], axis=-1),
                           IN_W).astype(jnp.bfloat16)
        state = node_update(lc, state, slab_b, S, C)                    # Pallas kernel B

    # projection: MVLinear(C -> 1, subspaces=False, bias at blade 0)
    v_flat = state[:, S:S + C8]
    x3 = v_flat.reshape(BN, C, 8)
    proj = jnp.einsum("nci,oc->noi", x3, params["proj_w"])
    proj = proj.at[:, :, 0].add(params["proj_b"][None, :])
    pred = proj[:, 0, 1:4]                                              # grade-1 part
    pred_pos = pred.reshape(batch_size, num_nodes, 3) + coords
    pred_pos = pred_pos.reshape(-1, 3)

    loss = jnp.mean((pred_pos - y.reshape(-1, 3)) ** 2, axis=1)
    return loss.mean(), {"loss": loss}


# ----------------------------------------------------------------------------
if __name__ == "__main__":
    B, N = 2, 5                 # 2 graphs, 5 bodies each (fully connected)
    S, C, L = 32, 8, 2          # hidden_features, hidden_features_v, num_layers

    key = jax.random.PRNGKey(0)
    k1, k2, k3, k4, kp = jax.random.split(key, 5)
    loc = jax.random.normal(k1, (B * N, 3), jnp.float32)
    vel = jax.random.normal(k2, (B * N, 3), jnp.float32)
    charges = jnp.sign(jax.random.normal(k3, (B * N, 1), jnp.float32)) + 0.0
    y = loc + 0.1 * jax.random.normal(k4, (B * N, 3), jnp.float32)

    send, rec = [], []
    for b in range(B):
        for i in range(N):
            for j in range(N):
                if i != j:
                    send.append(b * N + i)
                    rec.append(b * N + j)
    # sanity (review note): bincount(send) is used to normalize the rec-aggregation,
    # which only equals the PyTorch-reference behaviour visually for regular graphs.
    assert np.array_equal(np.bincount(send, minlength=B * N),
                          np.bincount(rec, minlength=B * N))
    send_idx = jnp.asarray(send, jnp.int32)
    rec_idx = jnp.asarray(rec, jnp.int32)

    params = init_model(kp, S, C, L)
    mats = build_static_mats(C)
    layer_consts = [prepare_layer(lp, mats, S, C) for lp in params["layers"]]

    fwd = jax.jit(lambda loc, vel, charges, send, rec, y: nbody_egnn_forward(
        params, layer_consts, S, C, B, N, loc, vel, charges, (send, rec), y))

    loss, aux = fwd(loc, vel, charges, send_idx, rec_idx, y)
    jax.block_until_ready(loss)
    assert jnp.isfinite(loss) and aux["loss"].shape == (B * N,)
    print("KERNEL_OK")
</pallas_src>

<mosaic_0001>
module attributes {stable_mosaic.version = 11 : i64} {
  func.func @_edge_kernel(%arg0: i32, %arg1: memref<32x128xbf16, #tpu.memory_space<vmem>>, %arg2: memref<64x64xbf16, #tpu.memory_space<vmem>>, %arg3: memref<128x32xbf16, #tpu.memory_space<vmem>>, %arg4: memref<32x32xbf16, #tpu.memory_space<vmem>>, %arg5: memref<32x32xbf16, #tpu.memory_space<vmem>>, %arg6: memref<32x64xbf16, #tpu.memory_space<vmem>>, %arg7: memref<5x128xf32, #tpu.memory_space<vmem>>, %arg8: memref<32x128xbf16, #tpu.memory_space<vmem>>) attributes {dimension_semantics = [#tpu.dimension_semantics<parallel>], iteration_bounds = array<i64: 2>, scalar_prefetch = 0 : i64, scratch_operands = 0 : i64, tpu.core_type = #tpu.core_type<tc>, window_params = [{transform_indices = @transform_0, window_bounds = array<i64: 32, 128>}, {pipeline_mode = #tpu.pipeline_mode<synchronous>, transform_indices = @transform_1, window_bounds = array<i64: 64, 64>}, {pipeline_mode = #tpu.pipeline_mode<synchronous>, transform_indices = @transform_2, window_bounds = array<i64: 128, 32>}, {pipeline_mode = #tpu.pipeline_mode<synchronous>, transform_indices = @transform_3, window_bounds = array<i64: 32, 32>}, {pipeline_mode = #tpu.pipeline_mode<synchronous>, transform_indices = @transform_4, window_bounds = array<i64: 32, 32>}, {pipeline_mode = #tpu.pipeline_mode<synchronous>, transform_indices = @transform_5, window_bounds = array<i64: 32, 64>}, {pipeline_mode = #tpu.pipeline_mode<synchronous>, transform_indices = @transform_6, window_bounds = array<i64: 5, 128>}, {transform_indices = @transform_7, window_bounds = array<i64: 32, 128>}]} {
    %c0 = arith.constant 0 : index
    %c0_0 = arith.constant 0 : index
    %0 = vector.load %arg1[%c0, %c0_0] : memref<32x128xbf16, #tpu.memory_space<vmem>>, vector<32x128xbf16>
    %c0_1 = arith.constant 0 : index
    %c0_2 = arith.constant 0 : index
    %1 = vector.load %arg7[%c0_1, %c0_2] : memref<5x128xf32, #tpu.memory_space<vmem>>, vector<1x64xf32>
    %c1 = arith.constant 1 : index
    %c0_3 = arith.constant 0 : index
    %2 = vector.load %arg7[%c1, %c0_3] : memref<5x128xf32, #tpu.memory_space<vmem>>, vector<1x32xf32>
    %c2 = arith.constant 2 : index
    %c0_4 = arith.constant 0 : index
    %3 = vector.load %arg7[%c2, %c0_4] : memref<5x128xf32, #tpu.memory_space<vmem>>, vector<1x32xf32>
    %c3 = arith.constant 3 : index
    %c0_5 = arith.constant 0 : index
    %4 = vector.load %arg7[%c3, %c0_5] : memref<5x128xf32, #tpu.memory_space<vmem>>, vector<1x32xf32>
    %c4 = arith.constant 4 : index
    %c0_6 = arith.constant 0 : index
    %5 = vector.load %arg7[%c4, %c0_6] : memref<5x128xf32, #tpu.memory_space<vmem>>, vector<1x64xf32>
    %6 = vector.extract_strided_slice %0 {offsets = [0, 64], sizes = [32, 64], strides = [1, 1]} : vector<32x128xbf16> to vector<32x64xbf16>
    %c0_7 = arith.constant 0 : index
    %c0_8 = arith.constant 0 : index
    %7 = vector.load %arg2[%c0_7, %c0_8] : memref<64x64xbf16, #tpu.memory_space<vmem>>, vector<64x64xbf16>
    %cst = arith.constant dense<0.000000e+00> : vector<32x64xf32>
    %8 = tpu.matmul %6, %7, %cst {dimension_numbers = #tpu.dot_dimension_numbers<[1], [0], [0], [1], [0, 0, 1, 1], [], []>} : vector<32x64xbf16>, vector<64x64xbf16>, vector<32x64xf32> -> vector<32x64xf32>
    %9 = vector.broadcast %1 : vector<1x64xf32> to vector<32x64xf32>
    %10 = arith.addf %8, %9 : vector<32x64xf32>
    %11 = vector.extract_strided_slice %0 {offsets = [0, 0], sizes = [32, 64], strides = [1, 1]} : vector<32x128xbf16> to vector<32x64xbf16>
    %12 = arith.mulf %10, %10 : vector<32x64xf32>
    %13 = arith.truncf %12 : vector<32x64xf32> to vector<32x64xbf16>
    %14 = tpu.concatenate %11, %13 in 1 : vector<32x64xbf16>, vector<32x64xbf16> -> vector<32x128xbf16>
    %c0_9 = arith.constant 0 : index
    %c0_10 = arith.constant 0 : index
    %15 = vector.load %arg3[%c0_9, %c0_10] : memref<128x32xbf16, #tpu.memory_space<vmem>>, vector<128x32xbf16>
    %cst_11 = arith.constant dense<0.000000e+00> : vector<32x32xf32>
    %16 = tpu.matmul %14, %15, %cst_11 {dimension_numbers = #tpu.dot_dimension_numbers<[1], [0], [0], [1], [0, 0, 1, 1], [], []>} : vector<32x128xbf16>, vector<128x32xbf16>, vector<32x32xf32> -> vector<32x32xf32>
    %17 = vector.broadcast %2 : vector<1x32xf32> to vector<32x32xf32>
    %18 = arith.addf %16, %17 : vector<32x32xf32>
    %cst_12 = arith.constant 0.000000e+00 : f32
    %19 = vector.broadcast %cst_12 : f32 to vector<32x32xf32>
    %20 = arith.maximumf %18, %19 : vector<32x32xf32>
    %21 = arith.truncf %20 : vector<32x32xf32> to vector<32x32xbf16>
    %c0_13 = arith.constant 0 : index
    %c0_14 = arith.constant 0 : index
    %22 = vector.load %arg4[%c0_13, %c0_14] : memref<32x32xbf16, #tpu.memory_space<vmem>>, vector<32x32xbf16>
    %cst_15 = arith.constant dense<0.000000e+00> : vector<32x32xf32>
    %23 = tpu.matmul %21, %22, %cst_15 {dimension_numbers = #tpu.dot_dimension_numbers<[1], [0], [0], [1], [0, 0, 1, 1], [], []>} : vector<32x32xbf16>, vector<32x32xbf16>, vector<32x32xf32> -> vector<32x32xf32>
    %24 = vector.broadcast %3 : vector<1x32xf32> to vector<32x32xf32>
    %25 = arith.addf %23, %24 : vector<32x32xf32>
    %26 = arith.truncf %25 : vector<32x32xf32> to vector<32x32xbf16>
    %c0_16 = arith.constant 0 : index
    %c0_17 = arith.constant 0 : index
    %27 = vector.load %arg5[%c0_16, %c0_17] : memref<32x32xbf16, #tpu.memory_space<vmem>>, vector<32x32xbf16>
    %cst_18 = arith.constant dense<0.000000e+00> : vector<32x32xf32>
    %28 = tpu.matmul %26, %27, %cst_18 {dimension_numbers = #tpu.dot_dimension_numbers<[1], [0], [0], [1], [0, 0, 1, 1], [], []>} : vector<32x32xbf16>, vector<32x32xbf16>, vector<32x32xf32> -> vector<32x32xf32>
    %29 = vector.broadcast %4 : vector<1x32xf32> to vector<32x32xf32>
    %30 = arith.addf %28, %29 : vector<32x32xf32>
    %cst_19 = arith.constant 0.000000e+00 : f32
    %31 = vector.broadcast %cst_19 : f32 to vector<32x32xf32>
    %32 = arith.maximumf %30, %31 : vector<32x32xf32>
    %33 = arith.truncf %32 : vector<32x32xf32> to vector<32x32xbf16>
    %c0_20 = arith.constant 0 : index
    %c0_21 = arith.constant 0 : index
    %34 = vector.load %arg6[%c0_20, %c0_21] : memref<32x64xbf16, #tpu.memory_space<vmem>>, vector<32x64xbf16>
    %cst_22 = arith.constant dense<0.000000e+00> : vector<32x64xf32>
    %35 = tpu.matmul %33, %34, %cst_22 {dimension_numbers = #tpu.dot_dimension_numbers<[1], [0], [0], [1], [0, 0, 1, 1], [], []>} : vector<32x32xbf16>, vector<32x64xbf16>, vector<32x64xf32> -> vector<32x64xf32>
    %36 = vector.broadcast %5 : vector<1x64xf32> to vector<32x64xf32>
    %37 = arith.addf %35, %36 : vector<32x64xf32>
    %38 = arith.mulf %10, %37 : vector<32x64xf32>
    %cst_23 = arith.constant 0.000000e+00 : f32
    %39 = vector.broadcast %cst_23 : f32 to vector<32x32xf32>
    %40 = tpu.concatenate %25, %38, %39 in 1 : vector<32x32xf32>, vector<32x64xf32>, vector<32x32xf32> -> vector<32x128xf32>
    %41 = arith.truncf %40 : vector<32x128xf32> to vector<32x128xbf16>
    %c0_24 = arith.constant 0 : index
    %c0_25 = arith.constant 0 : index
    %42 = vector.load %arg8[%c0_24, %c0_25] : memref<32x128xbf16, #tpu.memory_space<vmem>>, vector<32x128xbf16>
    tpu.vector_store %arg8[%c0_24, %c0_25], %41 {strides = array<i32>} : memref<32x128xbf16, #tpu.memory_space<vmem>>, vector<32x128xbf16>,
    return
  }
  func.func @transform_0(%arg0: i32) -> (i32, i32) {
    %c0_i32 = arith.constant 0 : i32
    %c0_i32_0 = arith.constant 0 : i32
    return %arg0, %c0_i32 : i32, i32
  }
  func.func @transform_1(%arg0: i32) -> (i32, i32) {
    %c0_i32 = arith.constant 0 : i32
    %c0_i32_0 = arith.constant 0 : i32
    %c0_i32_1 = arith.constant 0 : i32
    return %c0_i32, %c0_i32_0 : i32, i32
  }
  func.func @transform_2(%arg0: i32) -> (i32, i32) {
    %c0_i32 = arith.constant 0 : i32
    %c0_i32_0 = arith.constant 0 : i32
    %c0_i32_1 = arith.constant 0 : i32
    return %c0_i32, %c0_i32_0 : i32, i32
  }
  func.func @transform_3(%arg0: i32) -> (i32, i32) {
    %c0_i32 = arith.constant 0 : i32
    %c0_i32_0 = arith.constant 0 : i32
    %c0_i32_1 = arith.constant 0 : i32
    return %c0_i32, %c0_i32_0 : i32, i32
  }
  func.func @transform_4(%arg0: i32) -> (i32, i32) {
    %c0_i32 = arith.constant 0 : i32
    %c0_i32_0 = arith.constant 0 : i32
    %c0_i32_1 = arith.constant 0 : i32
    return %c0_i32, %c0_i32_0 : i32, i32
  }
  func.func @transform_5(%arg0: i32) -> (i32, i32) {
    %c0_i32 = arith.constant 0 : i32
    %c0_i32_0 = arith.constant 0 : i32
    %c0_i32_1 = arith.constant 0 : i32
    return %c0_i32, %c0_i32_0 : i32, i32
  }
  func.func @transform_6(%arg0: i32) -> (i32, i32) {
    %c0_i32 = arith.constant 0 : i32
    %c0_i32_0 = arith.constant 0 : i32
    %c0_i32_1 = arith.constant 0 : i32
    return %c0_i32, %c0_i32_0 : i32, i32
  }
  func.func @transform_7(%arg0: i32) -> (i32, i32) {
    %c0_i32 = arith.constant 0 : i32
    %c0_i32_0 = arith.constant 0 : i32
    return %arg0, %c0_i32 : i32, i32
  }
}

module attributes {stable_mosaic.version = 11 : i64} {
  func.func @_node_kernel(%arg0: i32, %arg1: memref<16x128xf32, #tpu.memory_space<vmem>>, %arg2: memref<16x128xbf16, #tpu.memory_space<vmem>>, %arg3: memref<64x32xbf16, #tpu.memory_space<vmem>>, %arg4: memref<32x32xbf16, #tpu.memory_space<vmem>>, %arg5: memref<64x512xbf16, #tpu.memory_space<vmem>>, %arg6: memref<64x512xbf16, #tpu.memory_space<vmem>>, %arg7: memref<128x64xbf16, #tpu.memory_space<vmem>>, %arg8: memref<64x8xbf16, #tpu.memory_space<vmem>>, %arg9: memref<4x128xf32, #tpu.memory_space<vmem>>, %arg10: memref<2x512xf32, #tpu.memory_space<vmem>>, %arg11: memref<16x128xf32, #tpu.memory_space<vmem>>) attributes {dimension_semantics = [#tpu.dimension_semantics<parallel>], iteration_bounds = array<i64: 1>, scalar_prefetch = 0 : i64, scratch_operands = 0 : i64, tpu.core_type = #tpu.core_type<tc>, window_params = [{transform_indices = @transform_0, window_bounds = array<i64: 16, 128>}, {transform_indices = @transform_1, window_bounds = array<i64: 16, 128>}, {pipeline_mode = #tpu.pipeline_mode<synchronous>, transform_indices = @transform_2, window_bounds = array<i64: 64, 32>}, {pipeline_mode = #tpu.pipeline_mode<synchronous>, transform_indices = @transform_3, window_bounds = array<i64: 32, 32>}, {pipeline_mode = #tpu.pipeline_mode<synchronous>, transform_indices = @transform_4, window_bounds = array<i64: 64, 512>}, {pipeline_mode = #tpu.pipeline_mode<synchronous>, transform_indices = @transform_5, window_bounds = array<i64: 64, 512>}, {pipeline_mode = #tpu.pipeline_mode<synchronous>, transform_indices = @transform_6, window_bounds = array<i64: 128, 64>}, {pipeline_mode = #tpu.pipeline_mode<synchronous>, transform_indices = @transform_7, window_bounds = array<i64: 64, 8>}, {pipeline_mode = #tpu.pipeline_mode<synchronous>, transform_indices = @transform_8, window_bounds = array<i64: 4, 128>}, {pipeline_mode = #tpu.pipeline_mode<synchronous>, transform_indices = @transform_9, window_bounds = array<i64: 2, 512>}, {transform_indices = @transform_10, window_bounds = array<i64: 16, 128>}]} {
    %c0 = arith.constant 0 : index
    %c0_0 = arith.constant 0 : index
    %0 = vector.load %arg1[%c0, %c0_0] : memref<16x128xf32, #tpu.memory_space<vmem>>, vector<16x128xf32>
    %c0_1 = arith.constant 0 : index
    %c0_2 = arith.constant 0 : index
    %1 = vector.load %arg2[%c0_1, %c0_2] : memref<16x128xbf16, #tpu.memory_space<vmem>>, vector<16x128xbf16>
    %2 = vector.extract_strided_slice %0 {offsets = [0, 0], sizes = [16, 32], strides = [1, 1]} : vector<16x128xf32> to vector<16x32xf32>
    %3 = vector.extract_strided_slice %0 {offsets = [0, 32], sizes = [16, 64], strides = [1, 1]} : vector<16x128xf32> to vector<16x64xf32>
    %4 = vector.extract_strided_slice %1 {offsets = [0, 64], sizes = [16, 64], strides = [1, 1]} : vector<16x128xbf16> to vector<16x64xbf16>
    %c0_3 = arith.constant 0 : index
    %c0_4 = arith.constant 0 : index
    %5 = vector.load %arg9[%c0_3, %c0_4] : memref<4x128xf32, #tpu.memory_space<vmem>>, vector<1x32xf32>
    %c1 = arith.constant 1 : index
    %c0_5 = arith.constant 0 : index
    %6 = vector.load %arg9[%c1, %c0_5] : memref<4x128xf32, #tpu.memory_space<vmem>>, vector<1x32xf32>
    %c2 = arith.constant 2 : index
    %c0_6 = arith.constant 0 : index
    %7 = vector.load %arg9[%c2, %c0_6] : memref<4x128xf32, #tpu.memory_space<vmem>>, vector<1x64xf32>
    %c3 = arith.constant 3 : index
    %c0_7 = arith.constant 0 : index
    %8 = vector.load %arg9[%c3, %c0_7] : memref<4x128xf32, #tpu.memory_space<vmem>>, vector<1x64xf32>
    %c0_8 = arith.constant 0 : index
    %c0_9 = arith.constant 0 : index
    %9 = vector.load %arg10[%c0_8, %c0_9] : memref<2x512xf32, #tpu.memory_space<vmem>>, vector<1x512xf32>
    %c1_10 = arith.constant 1 : index
    %c0_11 = arith.constant 0 : index
    %10 = vector.load %arg10[%c1_10, %c0_11] : memref<2x512xf32, #tpu.memory_space<vmem>>, vector<1x512xf32>
    %11 = vector.extract_strided_slice %1 {offsets = [0, 0], sizes = [16, 64], strides = [1, 1]} : vector<16x128xbf16> to vector<16x64xbf16>
    %c0_12 = arith.constant 0 : index
    %c0_13 = arith.constant 0 : index
    %12 = vector.load %arg3[%c0_12, %c0_13] : memref<64x32xbf16, #tpu.memory_space<vmem>>, vector<64x32xbf16>
    %cst = arith.constant dense<0.000000e+00> : vector<16x32xf32>
    %13 = tpu.matmul %11, %12, %cst {dimension_numbers = #tpu.dot_dimension_numbers<[1], [0], [0], [1], [0, 0, 1, 1], [], []>} : vector<16x64xbf16>, vector<64x32xbf16>, vector<16x32xf32> -> vector<16x32xf32>
    %14 = vector.broadcast %5 : vector<1x32xf32> to vector<16x32xf32>
    %15 = arith.addf %13, %14 : vector<16x32xf32>
    %cst_14 = arith.constant 0.000000e+00 : f32
    %16 = vector.broadcast %cst_14 : f32 to vector<16x32xf32>
    %17 = arith.maximumf %15, %16 : vector<16x32xf32>
    %18 = arith.truncf %17 : vector<16x32xf32> to vector<16x32xbf16>
    %c0_15 = arith.constant 0 : index
    %c0_16 = arith.constant 0 : index
    %19 = vector.load %arg4[%c0_15, %c0_16] : memref<32x32xbf16, #tpu.memory_space<vmem>>, vector<32x32xbf16>
    %cst_17 = arith.constant dense<0.000000e+00> : vector<16x32xf32>
    %20 = tpu.matmul %18, %19, %cst_17 {dimension_numbers = #tpu.dot_dimension_numbers<[1], [0], [0], [1], [0, 0, 1, 1], [], []>} : vector<16x32xbf16>, vector<32x32xbf16>, vector<16x32xf32> -> vector<16x32xf32>
    %21 = arith.addf %2, %20 : vector<16x32xf32>
    %22 = vector.broadcast %6 : vector<1x32xf32> to vector<16x32xf32>
    %23 = arith.addf %21, %22 : vector<16x32xf32>
    %c0_18 = arith.constant 0 : index
    %c0_19 = arith.constant 0 : index
    %24 = vector.load %arg5[%c0_18, %c0_19] : memref<64x512xbf16, #tpu.memory_space<vmem>>, vector<64x512xbf16>
    %cst_20 = arith.constant dense<0.000000e+00> : vector<16x512xf32>
    %25 = tpu.matmul %4, %24, %cst_20 {dimension_numbers = #tpu.dot_dimension_numbers<[1], [0], [0], [1], [0, 0, 1, 1], [], []>} : vector<16x64xbf16>, vector<64x512xbf16>, vector<16x512xf32> -> vector<16x512xf32>
    %26 = vector.broadcast %9 : vector<1x512xf32> to vector<16x512xf32>
    %27 = arith.addf %25, %26 : vector<16x512xf32>
    %c0_21 = arith.constant 0 : index
    %c0_22 = arith.constant 0 : index
    %28 = vector.load %arg6[%c0_21, %c0_22] : memref<64x512xbf16, #tpu.memory_space<vmem>>, vector<64x512xbf16>
    %cst_23 = arith.constant dense<0.000000e+00> : vector<16x512xf32>
    %29 = tpu.matmul %4, %28, %cst_23 {dimension_numbers = #tpu.dot_dimension_numbers<[1], [0], [0], [1], [0, 0, 1, 1], [], []>} : vector<16x64xbf16>, vector<64x512xbf16>, vector<16x512xf32> -> vector<16x512xf32>
    %30 = vector.broadcast %10 : vector<1x512xf32> to vector<16x512xf32>
    %31 = arith.addf %29, %30 : vector<16x512xf32>
    %32 = arith.mulf %27, %31 : vector<16x512xf32>
    %33 = vector.extract_strided_slice %32 {offsets = [0, 0], sizes = [16, 128], strides = [1, 1]} : vector<16x512xf32> to vector<16x128xf32>
    %34 = vector.extract_strided_slice %32 {offsets = [0, 128], sizes = [16, 128], strides = [1, 1]} : vector<16x512xf32> to vector<16x128xf32>
    %35 = arith.addf %33, %34 : vector<16x128xf32>
    %36 = vector.extract_strided_slice %32 {offsets = [0, 256], sizes = [16, 128], strides = [1, 1]} : vector<16x512xf32> to vector<16x128xf32>
    %37 = arith.addf %35, %36 : vector<16x128xf32>
    %38 = vector.extract_strided_slice %32 {offsets = [0, 384], sizes = [16, 128], strides = [1, 1]} : vector<16x512xf32> to vector<16x128xf32>
    %39 = arith.addf %37, %38 : vector<16x128xf32>
    %40 = vector.extract_strided_slice %39 {offsets = [0, 0], sizes = [16, 64], strides = [1, 1]} : vector<16x128xf32> to vector<16x64xf32>
    %41 = vector.extract_strided_slice %39 {offsets = [0, 64], sizes = [16, 64], strides = [1, 1]} : vector<16x128xf32> to vector<16x64xf32>
    %42 = arith.addf %40, %41 : vector<16x64xf32>
    %43 = arith.truncf %42 : vector<16x64xf32> to vector<16x64xbf16>
    %44 = tpu.concatenate %43, %4 in 1 : vector<16x64xbf16>, vector<16x64xbf16> -> vector<16x128xbf16>
    %c0_24 = arith.constant 0 : index
    %c0_25 = arith.constant 0 : index
    %45 = vector.load %arg7[%c0_24, %c0_25] : memref<128x64xbf16, #tpu.memory_space<vmem>>, vector<128x64xbf16>
    %cst_26 = arith.constant dense<0.000000e+00> : vector<16x64xf32>
    %46 = tpu.matmul %44, %45, %cst_26 {dimension_numbers = #tpu.dot_dimension_numbers<[1], [0], [0], [1], [0, 0, 1, 1], [], []>} : vector<16x128xbf16>, vector<128x64xbf16>, vector<16x64xf32> -> vector<16x64xf32>
    %47 = vector.broadcast %7 : vector<1x64xf32> to vector<16x64xf32>
    %48 = arith.addf %46, %47 : vector<16x64xf32>
    %49 = arith.mulf %48, %48 : vector<16x64xf32>
    %50 = arith.truncf %49 : vector<16x64xf32> to vector<16x64xbf16>
    %c0_27 = arith.constant 0 : index
    %c0_28 = arith.constant 0 : index
    %51 = vector.load %arg8[%c0_27, %c0_28] : memref<64x8xbf16, #tpu.memory_space<vmem>>, vector<64x8xbf16>
    %cst_29 = arith.constant dense<0.000000e+00> : vector<16x8xf32>
    %52 = tpu.matmul %50, %51, %cst_29 {dimension_numbers = #tpu.dot_dimension_numbers<[1], [0], [0], [1], [0, 0, 1, 1], [], []>} : vector<16x64xbf16>, vector<64x8xbf16>, vector<16x8xf32> -> vector<16x8xf32>
    %53 = arith.mulf %52, %52 : vector<16x8xf32>
    %cst_30 = arith.constant 1.000000e-16 : f32
    %54 = vector.broadcast %cst_30 : f32 to vector<16x8xf32>
    %55 = arith.addf %53, %54 : vector<16x8xf32>
    %56 = math.sqrt %55 : vector<16x8xf32>
    %57 = math.sqrt %56 : vector<16x8xf32>
    %cst_31 = arith.constant dense<0.000000e+00> : vector<16xf32>
    %58 = vector.multi_reduction <add>, %57, %cst_31 [1] : vector<16x8xf32> to vector<16xf32>
    %59 = vector.shape_cast %58 : vector<16xf32> to vector<16x1xf32>
    %cst_32 = arith.constant 8.000000e+00 : f32
    %60 = vector.broadcast %cst_32 : f32 to vector<16x1xf32>
    %61 = arith.divf %59, %60 : vector<16x1xf32>
    %cst_33 = arith.constant 9.99999997E-7 : f32
    %62 = vector.broadcast %cst_33 : f32 to vector<16x1xf32>
    %63 = arith.addf %61, %62 : vector<16x1xf32>
    %64 = vector.broadcast %8 : vector<1x64xf32> to vector<16x64xf32>
    %65 = arith.mulf %64, %48 : vector<16x64xf32>
    %66 = tpu.reciprocal %63 {approx = true} : vector<16x1xf32> -> vector<16x1xf32>
    %67 = vector.broadcast %66 : vector<16x1xf32> to vector<16x64xf32>
    %68 = arith.mulf %65, %67 : vector<16x64xf32>
    %69 = arith.addf %68, %3 : vector<16x64xf32>
    %cst_34 = arith.constant 0.000000e+00 : f32
    %70 = vector.broadcast %cst_34 : f32 to vector<16x32xf32>
    %71 = tpu.concatenate %23, %69, %70 in 1 : vector<16x32xf32>, vector<16x64xf32>, vector<16x32xf32> -> vector<16x128xf32>
    %c0_35 = arith.constant 0 : index
    %c0_36 = arith.constant 0 : index
    %72 = vector.load %arg11[%c0_35, %c0_36] : memref<16x128xf32, #tpu.memory_space<vmem>>, vector<16x128xf32>
    tpu.vector_store %arg11[%c0_35, %c0_36], %71 {strides = array<i32>} : memref<16x128xf32, #tpu.memory_space<vmem>>, vector<16x128xf32>,
    return
  }
  func.func @transform_0(%arg0: i32) -> (i32, i32) {
    %c0_i32 = arith.constant 0 : i32
    %c0_i32_0 = arith.constant 0 : i32
    return %arg0, %c0_i32 : i32, i32
  }
  func.func @transform_1(%arg0: i32) -> (i32, i32) {
    %c0_i32 = arith.constant 0 : i32
    %c0_i32_0 = arith.constant 0 : i32
    return %arg0, %c0_i32 : i32, i32
  }
  func.func @transform_2(%arg0: i32) -> (i32, i32) {
    %c0_i32 = arith.constant 0 : i32
    %c0_i32_0 = arith.constant 0 : i32
    %c0_i32_1 = arith.constant 0 : i32
    return %c0_i32, %c0_i32_0 : i32, i32
  }
  func.func @transform_3(%arg0: i32) -> (i32, i32) {
    %c0_i32 = arith.constant 0 : i32
    %c0_i32_0 = arith.constant 0 : i32
    %c0_i32_1 = arith.constant 0 : i32
    return %c0_i32, %c0_i32_0 : i32, i32
  }
  func.func @transform_4(%arg0: i32) -> (i32, i32) {
    %c0_i32 = arith.constant 0 : i32
    %c0_i32_0 = arith.constant 0 : i32
    %c0_i32_1 = arith.constant 0 : i32
    return %c0_i32, %c0_i32_0 : i32, i32
  }
  func.func @transform_5(%arg0: i32) -> (i32, i32) {
    %c0_i32 = arith.constant 0 : i32
    %c0_i32_0 = arith.constant 0 : i32
    %c0_i32_1 = arith.constant 0 : i32
    return %c0_i32, %c0_i32_0 : i32, i32
  }
  func.func @transform_6(%arg0: i32) -> (i32, i32) {
    %c0_i32 = arith.constant 0 : i32
    %c0_i32_0 = arith.constant 0 : i32
    %c0_i32_1 = arith.constant 0 : i32
    return %c0_i32, %c0_i32_0 : i32, i32
  }
  func.func @transform_7(%arg0: i32) -> (i32, i32) {
    %c0_i32 = arith.constant 0 : i32
    %c0_i32_0 = arith.constant 0 : i32
    %c0_i32_1 = arith.constant 0 : i32
    return %c0_i32, %c0_i32_0 : i32, i32
  }
  func.func @transform_8(%arg0: i32) -> (i32, i32) {
    %c0_i32 = arith.constant 0 : i32
    %c0_i32_0 = arith.constant 0 : i32
    %c0_i32_1 = arith.constant 0 : i32
    return %c0_i32, %c0_i32_0 : i32, i32
  }
  func.func @transform_9(%arg0: i32) -> (i32, i32) {
    %c0_i32 = arith.constant 0 : i32
    %c0_i32_0 = arith.constant 0 : i32
    %c0_i32_1 = arith.constant 0 : i32
    return %c0_i32, %c0_i32_0 : i32, i32
  }
  func.func @transform_10(%arg0: i32) -> (i32, i32) {
    %c0_i32 = arith.constant 0 : i32
    %c0_i32_0 = arith.constant 0 : i32
    return %arg0, %c0_i32 : i32, i32
  }
}

</mosaic_0001>

<bundles_post_ra>
// kernel: sub.0
= control target key start
LH: loop header
LB: loop body
LE: loop exit
PB: predicated region body
PF: predicated region fallthrough
CT: control target
= control target key end

     0   :  { %s34_s0 = inlined_call_operand.vmem [shape: f32[10,3], index: 0, kind: input, shape index: {}]   ;;  %s35_s1 = inlined_call_operand.vmem [shape: f32[10,3], index: 1, kind: input, shape index: {}]   ;;  %s36_s2 = inlined_call_operand.vmem [shape: f32[10,3], index: 2, kind: output, shape index: {}]  }
   0x1   :  { %v3_v0 = vld [vmem:[%s34_s0] sm:$0x7] }
   0x2   :  { %v4_v1 = vld [vmem:[%s35_s1] sm:$0x7] }
   0x3   :  { %v7_v2 = vsub.f32 %v3_v0, %v4_v1 }
   0x5   :  { %9 = vst [vmem:[%s36_s2] sm:$0xf] %v7_v2 }

// kernel: _lambda_.4
= control target key start
LH: loop header
LB: loop body
LE: loop exit
PB: predicated region body
PF: predicated region fallthrough
CT: control target
= control target key end

     0   :  { %s920_s24 = smov 0   ;;  %s1055_s0 = inlined_call_operand.vmem [shape: bf16[64,128], index: 0, kind: input, shape index: {}]   ;;  %s1056_s1 = inlined_call_operand.vmem [shape: bf16[64,64], index: 1, kind: input, shape index: {}]   ;;  %s1057_s2 = inlined_call_operand.vmem [shape: bf16[128,32], index: 2, kind: input, shape index: {}]   ;;  %s1058_s3 = inlined_call_operand.vmem [shape: bf16[32,32], index: 3, kind: input, shape index: {}]   ;;  %s1059_s4 = inlined_call_operand.vmem [shape: bf16[32,32], index: 4, kind: input, shape index: {}]   ;;  %s1060_s5 = inlined_call_operand.vmem [shape: bf16[32,64], index: 5, kind: input, shape index: {}]   ;;  %s1061_s6 = inlined_call_operand.vmem [shape: f32[5,128], index: 6, kind: input, shape index: {}]   ;;  %s1062_s7 = inlined_call_operand.vmem [shape: bf16[64,128], index: 7, kind: output, shape index: {}]  }
   0x1 LB: > { %s713_s25 = sadd.s32 4294967295, %s876_s24   ;;  %p717_p0 = scmp.ge.s32.totalorder %s876_s24, 1  ;;  %s876_s24 = sphi %s920_s24, %s17_s24  }
   0x2   : > { %p238_p1 = scmp.lt.s32.totalorder %s876_s24, 3 }
   0x4   : > { %p239_p2 = pnand %p717_p0, %p238_p1 }
   0x5   : > { %s718_s26 = sshll.u32 (!%p239_p2), %s713_s25, 2  ;;  %s878_s14 = smov (!%p239_p2), 64  }
   0x6   : > { %242 = sbr.rel (%p239_p2) target bundleno = 1080 (0x438), region = 48  ;;  %p271_p3 = scmp.lt.s32.totalorder (!%p239_p2), %s718_s26, 7 }
   0x7   : > { %s879_s16 = smov (!%p239_p2), 32  }
   0xb   : > { %v817_v0 = vld [vmem:[%s1056_s1 + $0x18] sm:$0xff]  ;;  %v816_v1 = vld [vmem:[%s1056_s1 + $0x10] sm:$0xff]  ;;  %s1064_s26 = smov (!%p271_p3, %s718_s26), 7  ;;  %v815_v2 = vld [vmem:[%s1056_s1 + $0x8] sm:$0xff]  ;;  %vm339_vm0 = vcmask 523264   ;;  %vm502_vm1 = vcmask 261120  }
   0xc   : > { %350 = vmatpush.bf16.msra.mxu0 %v817_v0  ;;  %s719_s8 = sshll.u32 %s1064_s26, 2  ;;  %v814_v4 = vld [vmem:[%s1056_s1] sm:$0xff]  ;;  %v825_v11 = vld [vmem:[%s1057_s2 + $0x38] sm:$0xff]  ;;  %v824_v12 = vld [vmem:[%s1057_s2 + $0x30] sm:$0xff]  ;;  %vm644_vm2 = vcmask 785408  }
   0xd   : > { %s274_s11 = scalar_lea.vmem %s1055_s0, %s719_s8  ;;  %v865_v8 = vld [vmem:[%s1061_s6] ss:$0 sm:$0xff]  ;;  %460 = vmatpush.bf16.msra.mxu1 %v825_v11  ;;  %v823_v16 = vld [vmem:[%s1057_s2 + $0x28] sm:$0xff]  ;;  %v821_v25 = vld [vmem:[%s1057_s2 + $0x18] sm:$0xff]  ;;  %s280_s19 = scalar_lea.vmem %s1062_s7, %s719_s8 }
   0xe   : > { %v812_v3 = vld [vmem:[%s274_s11] sm:$0xff]  ;;  %v813_v5 = vld [vmem:[%s274_s11 + $0x8] sm:$0xff]  ;;  %v820_v27 = vld [vmem:[%s1057_s2 + $0x10] sm:$0xff] }
   0xf   : > { %311 = vrot.lane.b32.xlu0 %v812_v3, %s878_s14  ;;  %v822_v20 = vld [vmem:[%s1057_s2 + $0x20] sm:$0xff]  ;;  %v819_v31 = vld [vmem:[%s1057_s2 + $0x8] sm:$0xff] }
  0x10   : > { %351 = vmatpush.bf16.msra.mxu0 %v816_v1  ;;  %v818_v35 = vld [vmem:[%s1057_s2] sm:$0xff]  ;;  %v827_v43 = vld [vmem:[%s1058_s3 + $0x8] sm:$0xff] }
  0x11   : > { %461 = vmatpush.bf16.msra.mxu1 %v824_v12  ;;  %515 = vmatpush.bf16.msra.mxu2 %v827_v43  ;;  %v826_v44 = vld [vmem:[%s1058_s3] sm:$0xff]  ;;  %v829_v45 = vld [vmem:[%s1059_s4 + $0x8] sm:$0xff] }
  0x12   : > { %843 = vmatpush.bf16.msra.mxu3 %v827_v43  ;;  %v866_v47 = vld [vmem:[%s1061_s6 + $0x1] ss:$0 sm:$0xff]  ;;  %v831_v62 = vld [vmem:[%s1060_s5 + $0x8] sm:$0xff]  ;;  %v867_v0 = vld [vmem:[%s1061_s6 + $0x2] ss:$0 sm:$0xff] }
  0x13   : > { %v828_v61 = vld [vmem:[%s1059_s4] sm:$0xff] }
  0x14   : > { %352 = vmatpush.bf16.msra.mxu0 %v815_v2  ;;  %v830_v11 = vld [vmem:[%s1060_s5] sm:$0xff] }
  0x15   : > { %462 = vmatpush.bf16.msra.mxu1 %v823_v16  ;;  %516 = vmatpush.bf16.msra.mxu2 %v826_v44 }
  0x16   : > { %844 = vmatpush.bf16.msra.mxu3 %v826_v44 }
  0x17   : > { %313 = vrot.lane.b32.xlu0 %v813_v5, %s878_s14 }
  0x18   : > { %353 = vmatpush.bf16.msra.mxu0 %v814_v4 }
  0x19   : > { %463 = vmatpush.bf16.msra.mxu1 %v822_v20  ;;  %607 = vmatpush.bf16.msrb.mxu2 %v831_v62 }
  0x1a   : > { %559 = vmatpush.bf16.msrb.mxu3 %v829_v45 }
  0x1d   : > { %464 = vmatpush.bf16.msra.mxu1 %v821_v25  ;;  %608 = vmatpush.bf16.msrb.mxu2 %v830_v11 }
  0x1e   : > { %560 = vmatpush.bf16.msrb.mxu3 %v828_v61 }
  0x21   : > { %465 = vmatpush.bf16.msra.mxu1 %v820_v27 }
  0x25   : > { %466 = vmatpush.bf16.msra.mxu1 %v819_v31  ;;  %v869_v31 = vld [vmem:[%s1061_s6 + $0x4] ss:$0 sm:$0xff] }
  0x29   : > { %467 = vmatpush.bf16.msra.mxu1 %v818_v35 }
  0x81   : > { %v312_v6 = vpop.permute.xlu0 %311 }
  0x82   : > { %746 = vmatmul.msk.bf16.vlgmr.msra.gmra.mxu0 %vm339_vm0, %v312_v6 }
  0x89   : > { %v314_v7 = vpop.permute.xlu0 %313 }
  0x92   : > { %747 = vmatmul.msk.bf16.gmra.mxu0 %vm339_vm0, %v314_v7 }
  0xff   : > { %v355_v9 = vpop.f32.mrf.mxu0 }
 0x100   : > { %v955_v10 = vadd.f32 %v865_v8, %v355_v9 }
 0x102   : > { %v365_v13 = vmul.f32 %v955_v10, %v955_v10 }
 0x104   : > { %v369_v17 = vpack.c.bf16 %v365_v13, %v365_v13  ;;  %v868_v13 = vld [vmem:[%s1061_s6 + $0x3] ss:$0 sm:$0xff] }
 0x106   : > { %v377_v21 = vunpack.c.l.b16 %v369_v17 }
 0x107   : > { %v357_v14 = vpop.f32.mrf.mxu0 }
 0x108   : > { %v965_v15 = vadd.f32 %v865_v8, %v357_v14 }
 0x10a   : > { %v366_v18 = vmul.f32 %v965_v15, %v965_v15 }
 0x10c   : > { %v370_v19 = vpack.c.bf16 %v366_v18, %v366_v18 }
 0x10e   : > { %v378_v22 = vunpack.c.l.b16 %v370_v19 }
 0x10f   : > { %v360_v23 = vpop.f32.mrf.mxu0 }
 0x110   : > { %v381_v24 = vpack.c.b16 %v378_v22, %v377_v21  ;;  %v978_v26 = vadd.f32 %v865_v8, %v360_v23 }
 0x112   : > { %383 = vrot.lane.b32.xlu1 %v381_v24, %s878_s14  ;;  %v367_v28 = vmul.f32 %v978_v26, %v978_v26 }
 0x114   : > { %v371_v32 = vpack.c.bf16 %v367_v28, %v367_v28 }
 0x116   : > { %v379_v36 = vunpack.c.l.b16 %v371_v32 }
 0x117   : > { %v362_v29 = vpop.f32.mrf.mxu0 }
 0x118   : > { %v986_v30 = vadd.f32 %v865_v8, %v362_v29 }
 0x11a   : > { %v368_v33 = vmul.f32 %v986_v30, %v986_v30 }
 0x11c   : > { %v372_v34 = vpack.c.bf16 %v368_v33, %v368_v33 }
 0x11e   : > { %v380_v37 = vunpack.c.l.b16 %v372_v34 }
 0x120   : > { %v382_v38 = vpack.c.b16 %v380_v37, %v379_v36 }
 0x122   : > { %385 = vrot.lane.b32.xlu1 %v382_v38, %s878_s14 }
 0x184   : > { %v384_v39 = vpop.permute.xlu1 %383 }
 0x185   : > { %v389_v40 = vsel %vm339_vm0, %v812_v3, %v384_v39 }
 0x186   : > { %468 = vmatmul.bf16.vlgmr.msra.gmra.mxu1 %v389_v40 }
 0x194   : > { %v386_v41 = vpop.permute.xlu1 %385 }
 0x195   : > { %v393_v42 = vsel %vm339_vm0, %v813_v5, %v386_v41 }
 0x196   : > { %473 = vmatmul.bf16.gmra.mxu1 %v393_v42 }
 0x203   : > { %v469_v46 = vpop.f32.mrf.mxu1 }
 0x204   : > { %v470_v48 = vadd.f32 %v866_v47, %v469_v46 }
 0x206   : > { %v479_v51 = vmax.f32 %v470_v48, 0.0 }
 0x20b   : > { %v471_v49 = vpop.f32.mrf.mxu1 }
 0x20c   : > { %v472_v50 = vadd.f32 %v866_v47, %v471_v49 }
 0x20e   : > { %v480_v52 = vmax.f32 %v472_v50, 0.0 }
 0x210   : > { %v483_v53 = vpack.c.bf16 %v480_v52, %v479_v51 }
 0x212   : > { %788 = vmatmul.msk.bf16.vlgmr.msra.gmra.mxu2 %vm502_vm1, %v483_v53 }
 0x213   : > { %v474_v54 = vpop.f32.mrf.mxu1 }
 0x214   : > { %v475_v55 = vadd.f32 %v866_v47, %v474_v54 }
 0x216   : > { %v481_v58 = vmax.f32 %v475_v55, 0.0 }
 0x21b   : > { %v476_v56 = vpop.f32.mrf.mxu1 }
 0x21c   : > { %v477_v57 = vadd.f32 %v866_v47, %v476_v56 }
 0x21e   : > { %v482_v59 = vmax.f32 %v477_v57, 0.0 }
 0x220   : > { %v484_v60 = vpack.c.bf16 %v482_v59, %v481_v58 }
 0x222   : > { %789 = vmatmul.msk.bf16.vlgmr.msra.gmra.mxu3 %vm502_vm1, %v484_v60 }
 0x295   : > { %v518_v63 = vpop.f32.mrf.mxu2 }
 0x296   : > { %v519_v2 = vadd.f32 %v867_v0, %v518_v63 }
 0x29d   : > { %v520_v1 = vpop.f32.mrf.mxu2 }
 0x29e   : > { %v521_v3 = vadd.f32 %v867_v0, %v520_v1 }
 0x2a0   : > { %v528_v4 = vpack.c.bf16 %v521_v3, %v519_v2 }
 0x2a2   : > { %798 = vmatmul.msk.bf16.vlgmr.msrb.gmra.mxu3 %vm502_vm1, %v528_v4 }
 0x2a5   : > { %v523_v5 = vpop.f32.mrf.mxu3 }
 0x2a6   : > { %v524_v7 = vadd.f32 %v867_v0, %v523_v5 }
 0x2ad   : > { %v525_v6 = vpop.f32.mrf.mxu3 }
 0x2ae   : > { %v526_v8 = vadd.f32 %v867_v0, %v525_v6 }
 0x2b0   : > { %v529_v9 = vpack.c.bf16 %v526_v8, %v524_v7 }
 0x2b2   : > { %799 = vmatmul.msk.bf16.gmra.mxu3 %vm502_vm1, %v529_v9 }
 0x325   : > { %v562_v12 = vpop.f32.mrf.mxu3 }
 0x326   : > { %v563_v14 = vadd.f32 %v868_v13, %v562_v12 }
 0x328   : > { %v572_v18 = vmax.f32 %v563_v14, 0.0 }
 0x32d   : > { %v564_v16 = vpop.f32.mrf.mxu3 }
 0x32e   : > { %v565_v17 = vadd.f32 %v868_v13, %v564_v16 }
 0x330   : > { %v573_v19 = vmax.f32 %v565_v17, 0.0 }
 0x332   : > { %v576_v20 = vpack.c.bf16 %v573_v19, %v572_v18 }
 0x334   : > { %808 = vmatmul.msk.bf16.vlgmr.msrb.gmra.mxu2 %vm502_vm1, %v576_v20 }
 0x335   : > { %v567_v21 = vpop.f32.mrf.mxu3 }
 0x336   : > { %v568_v22 = vadd.f32 %v868_v13, %v567_v21 }
 0x338   : > { %v574_v25 = vmax.f32 %v568_v22, 0.0 }
 0x33d   : > { %v569_v23 = vpop.f32.mrf.mxu3 }
 0x33e   : > { %v570_v24 = vadd.f32 %v868_v13, %v569_v23 }
 0x340   : > { %v575_v27 = vmax.f32 %v570_v24, 0.0 }
 0x342   : > { %v577_v28 = vpack.c.bf16 %v575_v27, %v574_v25 }
 0x344   : > { %809 = vmatmul.msk.bf16.gmra.mxu2 %vm502_vm1, %v577_v28 }
 0x3b7   : > { %v610_v29 = vpop.f32.mrf.mxu2 }
 0x3b8   : > { %v611_v32 = vadd.f32 %v869_v31, %v610_v29 }
 0x3ba   : > { %v620_v35 = vmul.f32 %v611_v32, %v955_v10 }
 0x3bf   : > { %v612_v33 = vpop.f32.mrf.mxu2 }
 0x3c0   : > { %v613_v34 = vadd.f32 %v869_v31, %v612_v33 }
 0x3c2   : > { %v621_v36 = vmul.f32 %v613_v34, %v965_v15 }
 0x3c4   : > { %v855_v37 = vpack.i.bf16 %v621_v36, %v620_v35 }
 0x3c6   : > { %856 = vrot.lane.b32.xlu2 %v855_v37, %s879_s16 }
 0x3c7   : > { %v615_v38 = vpop.f32.mrf.mxu2 }
 0x3c8   : > { %v616_v39 = vadd.f32 %v869_v31, %v615_v38 }
 0x3ca   : > { %v622_v42 = vmul.f32 %v616_v39, %v978_v26 }
 0x3cf   : > { %v617_v40 = vpop.f32.mrf.mxu2 }
 0x3d0   : > { %v618_v41 = vadd.f32 %v869_v31, %v617_v40 }
 0x3d2   : > { %v623_v43 = vmul.f32 %v618_v41, %v986_v30 }
 0x3d4   : > { %v860_v44 = vpack.i.bf16 %v623_v43, %v622_v42 }
 0x3d6   : > { %861 = vrot.lane.b32.xlu2 %v860_v44, %s879_s16 }
 0x420   : > { %v857_v45 = vpop.permute.xlu2 %856 }
 0x421   : > { %v859_v46 = vunpack.i.h.bf16 %v857_v45  ;;  %v858_v10 = vunpack.i.l.bf16 %v857_v45 }
 0x423   : > { %v641_v15 = vsel %vm502_vm1, %v521_v3, %v859_v46  ;;  %v640_v47 = vsel %vm502_vm1, %v519_v2, %v858_v10 }
 0x424   : > { %v646_v48 = vsel %vm644_vm2, %v641_v15, 0.0  ;;  %v645_v26 = vsel %vm644_vm2, %v640_v47, 0.0 }
 0x425   : > { %v835_v30 = vpack.c.bf16 %v646_v48, %v645_v26 }
 0x427   : > { %836 = vst [vmem:[%s280_s19] sm:$0xff] %v835_v30  }
 0x430   : > { %v862_v49 = vpop.permute.xlu2 %861 }
 0x431   : > { %v864_v50 = vunpack.i.h.bf16 %v862_v49  ;;  %v863_v51 = vunpack.i.l.bf16 %v862_v49 }
 0x433   : > { %v643_v52 = vsel %vm502_vm1, %v526_v8, %v864_v50  ;;  %v642_v53 = vsel %vm502_vm1, %v524_v7, %v863_v51 }
 0x434   : > { %v648_v54 = vsel %vm644_vm2, %v643_v52, 0.0  ;;  %v647_v55 = vsel %vm644_vm2, %v642_v53, 0.0 }
 0x435   : > { %v840_v56 = vpack.c.bf16 %v648_v54, %v647_v55 }
 0x437   : > { %842 = vst [vmem:[%s280_s19 + $0x8] sm:$0xff] %v840_v56  }
 0x438 PF: > { %s17_s24 = sadd.s32 1, %s876_s24  }
 0x439   : > { %p14_p4 = scmp.ge.s32.totalorder %s17_s24, 4  }
 0x43b   :  { %16 = sbr.rel (!%p14_p4) target bundleno = 1 (0x1), region = 78 }

// kernel: _lambda_.5
= control target key start
LH: loop header
LB: loop body
LE: loop exit
PB: predicated region body
PF: predicated region fallthrough
CT: control target
= control target key end

     0   :  { %s1032_s23 = smov 64   ;;  %vm85_vm0 = vcmask 523264   ;;  %vm122_vm1 = vcmask 261120   ;;  %s1033_s29 = smov 96   ;;  %vm689_vm7 = vcmask 64512   ;;  %vm734_vm12 = vcmask 785408   ;;  %s1426_s2 = inlined_call_operand.vmem [shape: bf16[64,32], index: 2, kind: input, shape index: {}]   ;;  %s1427_s1 = inlined_call_operand.vmem [shape: bf16[16,128], index: 1, kind: input, shape index: {}]   ;;  %s1428_s4 = inlined_call_operand.vmem [shape: bf16[64,512], index: 4, kind: input, shape index: {}]   ;;  %s1429_s8 = inlined_call_operand.vmem [shape: f32[4,128], index: 8, kind: input, shape index: {}]   ;;  %s1430_s5 = inlined_call_operand.vmem [shape: bf16[64,512], index: 5, kind: input, shape index: {}]   ;;  %s1431_s3 = inlined_call_operand.vmem [shape: bf16[32,32], index: 3, kind: input, shape index: {}]   ;;  %s1432_s6 = inlined_call_operand.vmem [shape: bf16[128,64], index: 6, kind: input, shape index: {}]   ;;  %s1433_s9 = inlined_call_operand.vmem [shape: f32[2,512], index: 9, kind: input, shape index: {}]   ;;  %s1434_s7 = inlined_call_operand.vmem [shape: bf16[64,8], index: 7, kind: input, shape index: {}]   ;;  %s1435_s0 = inlined_call_operand.vmem [shape: f32[16,128], index: 0, kind: input, shape index: {}]   ;;  %s1436_s10 = inlined_call_operand.vmem [shape: f32[16,128], index: 10, kind: output, shape index: {}]  }
   0x1   :  { %v963_v0 = vld [vmem:[%s1426_s2 + $0x18] sm:$0xff]  ;;  %v1097_v1 = vld [vmem:[%s1427_s1] sm:$0xff]  ;;  %v962_v3 = vld [vmem:[%s1426_s2 + $0x10] sm:$0xff] }
   0x2   :  { %v978_v2 = vld [vmem:[%s1428_s4 + $0x64] sm:$0xf]  ;;  %93 = vmatpush.bf16.msra.mxu0 %v963_v0  ;;  %v826_v4 = vld [vmem:[%s1428_s4 + $0x70] sm:$0xf0]  ;;  %170 = vrot.lane.b32.xlu0 %v1097_v1, %s1032_s23  ;;  %v961_v9 = vld [vmem:[%s1426_s2 + $0x8] sm:$0xff] }
   0x3   :  { %v829_v5 = vor.u32 %v978_v2, %v826_v4  ;;  %v974_v6 = vld [vmem:[%s1428_s4 + $0x44] sm:$0xf]  ;;  %v810_v7 = vld [vmem:[%s1428_s4 + $0x50] sm:$0xf0]  ;;  %v979_v10 = vld [vmem:[%s1428_s4 + $0x6c] sm:$0xf] }
   0x4   :  { %v813_v8 = vor.u32 %v974_v6, %v810_v7  ;;  %v834_v11 = vld [vmem:[%s1428_s4 + $0x78] sm:$0xf0]  ;;  %v960_v12 = vld [vmem:[%s1426_s2] sm:$0xff]  ;;  %v975_v14 = vld [vmem:[%s1428_s4 + $0x4c] sm:$0xf] }
   0x5   :  { %273 = vmatpush.bf16.msra.mxu3 %v829_v5  ;;  %v837_v13 = vor.u32 %v979_v10, %v834_v11  ;;  %v818_v15 = vld [vmem:[%s1428_s4 + $0x58] sm:$0xf0]  ;;  %v970_v17 = vld [vmem:[%s1428_s4 + $0x24] sm:$0xf]  ;;  %v794_v18 = vld [vmem:[%s1428_s4 + $0x30] sm:$0xf0] }
   0x6   :  { %94 = vmatpush.bf16.msra.mxu0 %v962_v3  ;;  %v821_v16 = vor.u32 %v975_v14, %v818_v15  ;;  %v971_v19 = vld [vmem:[%s1428_s4 + $0x2c] sm:$0xf]  ;;  %v797_v20 = vor.u32 %v970_v17, %v794_v18  ;;  %v802_v21 = vld [vmem:[%s1428_s4 + $0x38] sm:$0xf0]  ;;  %v966_v23 = vld [vmem:[%s1428_s4 + $0x4] sm:$0xf] }
   0x7   :  { %v805_v22 = vor.u32 %v971_v19, %v802_v21  ;;  %v778_v24 = vld [vmem:[%s1428_s4 + $0x10] sm:$0xf0]  ;;  %v967_v25 = vld [vmem:[%s1428_s4 + $0xc] sm:$0xf]  ;;  %v786_v27 = vld [vmem:[%s1428_s4 + $0x18] sm:$0xf0] }
   0x8   :  { %v781_v26 = vor.u32 %v966_v23, %v778_v24  ;;  %v789_v28 = vor.u32 %v967_v25, %v786_v27  ;;  %v892_v29 = vld [vmem:[%s1430_s5 + $0x60] sm:$0xf]  ;;  %v996_v30 = vld [vmem:[%s1430_s5 + $0x6c] sm:$0xf0]  ;;  %v994_v31 = vld [vmem:[%s1430_s5 + $0x64] sm:$0xf] }
   0x9   :  { %274 = vmatpush.bf16.msra.mxu3 %v813_v8  ;;  %v965_v32 = vld [vmem:[%s1431_s3 + $0x8] sm:$0xff]  ;;  %v893_v33 = vor.u32 %v996_v30, %v892_v29  ;;  %v894_v34 = vld [vmem:[%s1430_s5 + $0x70] sm:$0xf0]  ;;  %v902_v38 = vld [vmem:[%s1430_s5 + $0x78] sm:$0xf0] }
   0xa   :  { %95 = vmatpush.bf16.msra.mxu0 %v961_v9  ;;  %v995_v35 = vld [vmem:[%s1430_s5 + $0x6c] sm:$0xf]  ;;  %v897_v37 = vor.u32 %v994_v31, %v894_v34  ;;  %132 = vmatpush.bf16.msra.mxu1 %v965_v32  ;;  %v876_v40 = vld [vmem:[%s1430_s5 + $0x40] sm:$0xf]  ;;  %v992_v41 = vld [vmem:[%s1430_s5 + $0x4c] sm:$0xf0] }
   0xb   :  { %v905_v39 = vor.u32 %v995_v35, %v902_v38  ;;  %420 = vmatpush.bf16.msra.mxu2 %v893_v33  ;;  %v990_v42 = vld [vmem:[%s1430_s5 + $0x44] sm:$0xf]  ;;  %v877_v44 = vor.u32 %v992_v41, %v876_v40  ;;  %v878_v45 = vld [vmem:[%s1430_s5 + $0x50] sm:$0xf0]  ;;  %v991_v46 = vld [vmem:[%s1430_s5 + $0x4c] sm:$0xf] }
   0xc   :  { %v964_v43 = vld [vmem:[%s1431_s3] sm:$0xff]  ;;  %v881_v47 = vor.u32 %v990_v42, %v878_v45  ;;  %v886_v48 = vld [vmem:[%s1430_s5 + $0x58] sm:$0xf0]  ;;  %v980_v51 = vld [vmem:[%s1428_s4 + $0x6c] sm:$0xf0] }
   0xd   :  { %275 = vmatpush.bf16.msra.mxu3 %v797_v20  ;;  %v889_v49 = vor.u32 %v991_v46, %v886_v48  ;;  %v824_v50 = vld [vmem:[%s1428_s4 + $0x60] sm:$0xf]  ;;  %v988_v54 = vld [vmem:[%s1430_s5 + $0x2c] sm:$0xf0]  ;;  %v986_v55 = vld [vmem:[%s1430_s5 + $0x24] sm:$0xf] }
   0xe   :  { %96 = vmatpush.bf16.msra.mxu0 %v960_v12  ;;  %133 = vmatpush.bf16.msra.mxu1 %v964_v43  ;;  %v825_v52 = vor.u32 %v980_v51, %v824_v50  ;;  %v860_v53 = vld [vmem:[%s1430_s5 + $0x20] sm:$0xf]  ;;  %v862_v57 = vld [vmem:[%s1430_s5 + $0x30] sm:$0xf0]  ;;  %v987_v58 = vld [vmem:[%s1430_s5 + $0x2c] sm:$0xf] }
   0xf   :  { %421 = vmatpush.bf16.msra.mxu2 %v877_v44  ;;  %v861_v56 = vor.u32 %v988_v54, %v860_v53  ;;  %v870_v59 = vld [vmem:[%s1430_s5 + $0x38] sm:$0xf0]  ;;  %v865_v60 = vor.u32 %v986_v55, %v862_v57  ;;  %v808_v62 = vld [vmem:[%s1428_s4 + $0x40] sm:$0xf]  ;;  %v976_v63 = vld [vmem:[%s1428_s4 + $0x4c] sm:$0xf0] }
  0x10   :  { %v873_v61 = vor.u32 %v987_v58, %v870_v59  ;;  %v844_v0 = vld [vmem:[%s1430_s5] sm:$0xf]  ;;  %v809_v2 = vor.u32 %v976_v63, %v808_v62  ;;  %v984_v3 = vld [vmem:[%s1430_s5 + $0xc] sm:$0xf0]  ;;  %v982_v4 = vld [vmem:[%s1430_s5 + $0x4] sm:$0xf] }
  0x11   :  { %764 = vmatmul.msk.bf16.vlgmr.msra.gmra.mxu0 %vm85_vm0, %v1097_v1  ;;  %276 = vmatpush.bf16.msra.mxu3 %v781_v26  ;;  %v846_v5 = vld [vmem:[%s1430_s5 + $0x10] sm:$0xf0]  ;;  %v845_v6 = vor.u32 %v984_v3, %v844_v0  ;;  %v983_v8 = vld [vmem:[%s1430_s5 + $0xc] sm:$0xf]  ;;  %v854_v9 = vld [vmem:[%s1430_s5 + $0x18] sm:$0xf0] }
  0x12   :  { %301 = vmatpush.bf16.msrb.mxu0 %v837_v13  ;;  %259 = vmatpush.bf16.msrb.mxu1 %v825_v52  ;;  %v849_v7 = vor.u32 %v982_v4, %v846_v5  ;;  %v792_v10 = vld [vmem:[%s1428_s4 + $0x20] sm:$0xf]  ;;  %v857_v11 = vor.u32 %v983_v8, %v854_v9  ;;  %v972_v12 = vld [vmem:[%s1428_s4 + $0x2c] sm:$0xf0]  ;;  %v981_v23 = vld [vmem:[%s1428_s4 + $0x74] sm:$0xf0] }
  0x13   :  { %422 = vmatpush.bf16.msra.mxu2 %v861_v56  ;;  %v793_v13 = vor.u32 %v972_v12, %v792_v10  ;;  %v776_v14 = vld [vmem:[%s1428_s4] sm:$0xf]  ;;  %v968_v15 = vld [vmem:[%s1428_s4 + $0xc] sm:$0xf0]  ;;  %v977_v29 = vld [vmem:[%s1428_s4 + $0x54] sm:$0xf0] }
  0x14   :  { %v1014_v18 = vld [vmem:[%s1429_s8] ss:$0 sm:$0xff]  ;;  %v800_v31 = vld [vmem:[%s1428_s4 + $0x28] sm:$0xf]  ;;  %v973_v32 = vld [vmem:[%s1428_s4 + $0x34] sm:$0xf0] }
  0x15   :  { %434 = vmatpush.bf16.msrb.mxu3 %v897_v37  ;;  %v801_v33 = vor.u32 %v973_v32, %v800_v31  ;;  %v784_v34 = vld [vmem:[%s1428_s4 + $0x8] sm:$0xf]  ;;  %v969_v35 = vld [vmem:[%s1428_s4 + $0x14] sm:$0xf0] }
  0x16   :  { %302 = vmatpush.bf16.msrb.mxu0 %v821_v16  ;;  %260 = vmatpush.bf16.msrb.mxu1 %v809_v2  ;;  %v777_v16 = vor.u32 %v968_v15, %v776_v14  ;;  %v785_v37 = vor.u32 %v969_v35, %v784_v34  ;;  %v900_v38 = vld [vmem:[%s1430_s5 + $0x68] sm:$0xf]  ;;  %v993_v42 = vld [vmem:[%s1430_s5 + $0x54] sm:$0xf0] }
  0x17   :  { %423 = vmatpush.bf16.msra.mxu2 %v845_v6  ;;  %v884_v41 = vld [vmem:[%s1430_s5 + $0x48] sm:$0xf]  ;;  %v989_v45 = vld [vmem:[%s1430_s5 + $0x34] sm:$0xf0] }
  0x18   :  { %v885_v43 = vor.u32 %v993_v42, %v884_v41  ;;  %v868_v44 = vld [vmem:[%s1430_s5 + $0x28] sm:$0xf]  ;;  %v985_v48 = vld [vmem:[%s1430_s5 + $0x14] sm:$0xf0] }
  0x19   :  { %435 = vmatpush.bf16.msrb.mxu3 %v881_v47  ;;  %v869_v46 = vor.u32 %v989_v45, %v868_v44  ;;  %v852_v47 = vld [vmem:[%s1430_s5 + $0x8] sm:$0xf]  ;;  %v1005_v58 = vld [vmem:[%s1432_s6 + $0x38] sm:$0xff] }
  0x1a   :  { %303 = vmatpush.bf16.msrb.mxu0 %v805_v22  ;;  %261 = vmatpush.bf16.msrb.mxu1 %v793_v13  ;;  %v832_v22 = vld [vmem:[%s1428_s4 + $0x68] sm:$0xf] }
  0x1b   :  { %v833_v26 = vor.u32 %v981_v23, %v832_v22  ;;  %571 = vmatpush.bf16.msrb.mxu2 %v1005_v58  ;;  %v1003_v4 = vld [vmem:[%s1432_s6 + $0x28] sm:$0xff] }
  0x1d   :  { %436 = vmatpush.bf16.msrb.mxu3 %v865_v60  ;;  %v44_v60 = vld [vmem:[%s1433_s9] ss:$2 sm:$0xf] }
  0x1e   :  { %304 = vmatpush.bf16.msrb.mxu0 %v789_v28  ;;  %262 = vmatpush.bf16.msrb.mxu1 %v777_v16  ;;  %v816_v28 = vld [vmem:[%s1428_s4 + $0x48] sm:$0xf]  ;;  %v163_v62 = vperm.slane %v44_v60, 1  ;;  %v162_v3 = vperm.slane %v44_v60, 0  ;;  %v165_v13 = vperm.slane %v44_v60, 3  ;;  %v164_v15 = vperm.slane %v44_v60, 2 }
  0x1f   :  { %v817_v30 = vor.u32 %v977_v29, %v816_v28 }
  0x21   :  { %437 = vmatpush.bf16.msrb.mxu3 %v849_v7 }
  0x22   :  { %462 = vmatpush.bf16.msra.mxu0 %v905_v39  ;;  %v997_v39 = vld [vmem:[%s1430_s5 + $0x74] sm:$0xf0] }
  0x23   :  { %v901_v40 = vor.u32 %v997_v39, %v900_v38 }
  0x26   :  { %463 = vmatpush.bf16.msra.mxu0 %v889_v49  ;;  %v853_v49 = vor.u32 %v985_v48, %v852_v47 }
  0x2a   :  { %464 = vmatpush.bf16.msra.mxu0 %v873_v61  ;;  %v743_v61 = vld [vmem:[%s1433_s9 + $0x1] ss:$2 sm:$0xf] }
  0x2b   :  { %v328_v63 = vperm.slane %v743_v61, 0  ;;  %v329_v2 = vperm.slane %v743_v61, 1  ;;  %v331_v14 = vperm.slane %v743_v61, 3  ;;  %v330_v16 = vperm.slane %v743_v61, 2 }
  0x2e   :  { %465 = vmatpush.bf16.msra.mxu0 %v857_v11  ;;  %v1002_v11 = vld [vmem:[%s1432_s6 + $0x20] sm:$0xff] }
  0x74   :  { %v1178_v36 = vpop.permute.xlu0 %170 }
  0x75   :  { %839 = vmatmul.msk.bf16.vlgmr.msra.gmra.mxu3 %vm85_vm0, %v1178_v36  ;;  %841 = vmatmul.msk.bf16.vlgmr.msrb.gmra.mxu0 %vm85_vm0, %v1178_v36 }
  0x76   :  { %906 = vmatmul.msk.bf16.vlgmr.msra.gmra.mxu2 %vm85_vm0, %v1178_v36 }
  0x85   :  { %907 = vmatmul.msk.bf16.vlgmr.msrb.gmra.mxu3 %vm85_vm0, %v1178_v36  ;;  %909 = vmatmul.msk.bf16.vlgmr.msra.gmra.mxu0 %vm85_vm0, %v1178_v36 }
  0x8e   :  { %v98_v17 = vpop.f32.mrf.mxu0 }
  0x8f   :  { %v99_v19 = vadd.f32 %v1014_v18, %v98_v17 }
  0x91   :  { %v103_v24 = vmax.f32 %v99_v19, 0.0 }
  0x96   :  { %v100_v20 = vpop.f32.mrf.mxu0 }
  0x97   :  { %v101_v21 = vadd.f32 %v1014_v18, %v100_v20 }
  0x99   :  { %v104_v25 = vmax.f32 %v101_v21, 0.0 }
  0x9b   :  { %v105_v27 = vpack.c.bf16 %v104_v25, %v103_v24 }
  0x9d   :  { %773 = vmatmul.msk.bf16.vlgmr.msra.gmra.mxu1 %vm122_vm1, %v105_v27 }
  0x9e   :  { %287 = vmatpush.bf16.msra.mxu1 %v833_v26 }
  0xa2   :  { %288 = vmatpush.bf16.msra.mxu1 %v817_v30 }
  0xa6   :  { %289 = vmatpush.bf16.msra.mxu1 %v801_v33 }
  0xaa   :  { %290 = vmatpush.bf16.msra.mxu1 %v785_v37 }
  0xad   :  { %838 = vmatmul.msk.bf16.vlgmr.msrb.gmra.mxu1 %vm85_vm0, %v1178_v36 }
  0xae   :  { %448 = vmatpush.bf16.msrb.mxu1 %v901_v40 }
  0xb2   :  { %449 = vmatpush.bf16.msrb.mxu1 %v885_v43 }
  0xb6   :  { %450 = vmatpush.bf16.msrb.mxu1 %v869_v46 }
  0xba   :  { %451 = vmatpush.bf16.msrb.mxu1 %v853_v49  ;;  %v1001_v49 = vld [vmem:[%s1432_s6 + $0x18] sm:$0xff] }
  0xbd   :  { %840 = vmatmul.msk.bf16.vlgmr.msra.gmra.mxu1 %vm85_vm0, %v1178_v36 }
  0xcd   :  { %908 = vmatmul.msk.bf16.vlgmr.msrb.gmra.mxu1 %vm85_vm0, %v1178_v36  ;;  %v1004_v36 = vld [vmem:[%s1432_s6 + $0x30] sm:$0xff] }
  0xce   :  { %572 = vmatpush.bf16.msrb.mxu2 %v1004_v36 }
  0xd2   :  { %573 = vmatpush.bf16.msrb.mxu2 %v1003_v4  ;;  %v1006_v4 = vld [vmem:[%s1434_s7] sm:$0xff] }
  0xd6   :  { %574 = vmatpush.bf16.msrb.mxu2 %v1002_v11 }
  0xda   :  { %575 = vmatpush.bf16.msrb.mxu2 %v1001_v49 }
  0xf2   :  { %v306_v54 = vpop.f32.mrf.mxu0 }
  0xf3   :  { %v307_v20 = vadd.f32 %v306_v54, %v165_v13  ;;  %v998_v54 = vld [vmem:[%s1432_s6] sm:$0xff] }
  0xf8   :  { %v278_v53 = vpop.f32.mrf.mxu3 }
  0xf9   :  { %v425_v0 = vpop.f32.mrf.mxu2  ;;  %v279_v7 = vadd.f32 %v278_v53, %v163_v62  ;;  %v999_v53 = vld [vmem:[%s1432_s6 + $0x8] sm:$0xff] }
  0xfa   :  { %v308_v59 = vpop.f32.mrf.mxu0  ;;  %v426_v8 = vadd.f32 %v425_v0, %v328_v63 }
  0xfb   :  { %v309_v38 = vadd.f32 %v308_v59, %v165_v13 }
 0x100   :  { %v280_v56 = vpop.f32.mrf.mxu3 }
 0x101   :  { %v427_v24 = vpop.f32.mrf.mxu2  ;;  %v281_v29 = vadd.f32 %v280_v56, %v163_v62 }
 0x102   :  { %v467_v12 = vpop.f32.mrf.mxu0  ;;  %v428_v31 = vadd.f32 %v427_v24, %v328_v63 }
 0x103   :  { %v468_v21 = vadd.f32 %v467_v12, %v331_v14  ;;  %v1397_v12 = vld [vmem:[%s1435_s0 + $0x8] sm:$0xff] }
 0x105   :  { %v475_v30 = vmul.f32 %v468_v21, %v307_v20 }
 0x108   :  { %v439_v5 = vpop.f32.mrf.mxu3 }
 0x109   :  { %v440_v9 = vadd.f32 %v439_v5, %v329_v2 }
 0x10a   :  { %v469_v34 = vpop.f32.mrf.mxu0 }
 0x10b   :  { %v473_v17 = vmul.f32 %v440_v9, %v279_v7  ;;  %v470_v40 = vadd.f32 %v469_v34, %v331_v14 }
 0x10d   :  { %v479_v46 = vmul.f32 %v470_v40, %v309_v38 }
 0x110   :  { %v441_v25 = vpop.f32.mrf.mxu3 }
 0x111   :  { %v442_v32 = vadd.f32 %v441_v25, %v329_v2  ;;  %v1008_v2 = vld [vmem:[%s1434_s7 + $0x10] sm:$0xff] }
 0x113   :  { %v477_v41 = vmul.f32 %v442_v32, %v281_v29 }
 0x11a   :  { %v1332_v50 = vpop.f32.mrf.mxu1 }
 0x122   :  { %v1334_v51 = vpop.f32.mrf.mxu1 }
 0x12a   :  { %v264_v52 = vpop.f32.mrf.mxu1 }
 0x12b   :  { %v265_v10 = vadd.f32 %v264_v52, %v162_v3  ;;  %v1000_v52 = vld [vmem:[%s1432_s6 + $0x10] sm:$0xff] }
 0x12c   :  { %576 = vmatpush.bf16.msrb.mxu2 %v1000_v52 }
 0x12d   :  { %v472_v18 = vmul.f32 %v426_v8, %v265_v10 }
 0x12f   :  { %v480_v26 = vadd.f32 %v473_v17, %v472_v18 }
 0x130   :  { %577 = vmatpush.bf16.msrb.mxu2 %v999_v53 }
 0x132   :  { %v266_v55 = vpop.f32.mrf.mxu1 }
 0x133   :  { %v267_v27 = vadd.f32 %v266_v55, %v162_v3  ;;  %v1009_v55 = vld [vmem:[%s1434_s7 + $0x18] sm:$0xff]  ;;  %v1007_v3 = vld [vmem:[%s1434_s7 + $0x8] sm:$0xff] }
 0x134   :  { %578 = vmatpush.bf16.msrb.mxu2 %v998_v54  ;;  %627 = vmatpush.bf16.msra.mxu3 %v1009_v55 }
 0x135   :  { %v476_v35 = vmul.f32 %v428_v31, %v267_v27 }
 0x137   :  { %v481_v44 = vadd.f32 %v477_v41, %v476_v35 }
 0x138   :  { %628 = vmatpush.bf16.msra.mxu3 %v1008_v2 }
 0x13a   :  { %v292_v57 = vpop.f32.mrf.mxu1 }
 0x13b   :  { %v293_v22 = vadd.f32 %v292_v57, %v164_v15 }
 0x13c   :  { %629 = vmatpush.bf16.msra.mxu3 %v1007_v3 }
 0x140   :  { %630 = vmatpush.bf16.msra.mxu3 %v1006_v4 }
 0x142   :  { %v294_v6 = vpop.f32.mrf.mxu1 }
 0x143   :  { %v295_v42 = vadd.f32 %v294_v6, %v164_v15 }
 0x14a   :  { %v453_v19 = vpop.f32.mrf.mxu1 }
 0x14b   :  { %v454_v23 = vadd.f32 %v453_v19, %v330_v16 }
 0x14d   :  { %v474_v28 = vmul.f32 %v454_v23, %v293_v22 }
 0x14f   :  { %v482_v33 = vadd.f32 %v480_v26, %v474_v28 }
 0x151   :  { %v484_v37 = vadd.f32 %v482_v33, %v475_v30 }
 0x152   :  { %v455_v39 = vpop.f32.mrf.mxu1 }
 0x153   :  { %v456_v43 = vadd.f32 %v455_v39, %v330_v16  ;;  %488 = vrot.lane.b32.xlu0 %v484_v37, %s1032_s23 }
 0x155   :  { %v478_v45 = vmul.f32 %v456_v43, %v295_v42 }
 0x157   :  { %v483_v47 = vadd.f32 %v481_v44, %v478_v45 }
 0x159   :  { %v485_v48 = vadd.f32 %v483_v47, %v479_v46 }
 0x15b   :  { %490 = vrot.lane.b32.xlu1 %v485_v48, %s1032_s23  ;;  %718 = vrot.lane.b32.xlu0 %v1397_v12, %s1033_s29 }
 0x1c5   :  { %v489_v56 = vpop.permute.xlu0 %488 }
 0x1c6   :  { %v494_v57 = vadd.f32 %v489_v56, %v484_v37 }
 0x1c8   :  { %v496_v59 = vpack.c.bf16 %v494_v57, %v494_v57 }
 0x1ca   :  { %v500_v61 = vunpack.c.l.b16 %v496_v59 }
 0x1cd   :  { %v491_v58 = vpop.permute.xlu1 %490 }
 0x1ce   :  { %v495_v36 = vadd.f32 %v491_v58, %v485_v48 }
 0x1d0   :  { %v497_v60 = vpack.c.bf16 %v495_v36, %v495_v36 }
 0x1d2   :  { %v501_v62 = vunpack.c.l.b16 %v497_v60 }
 0x1d4   :  { %v502_v63 = vpack.c.b16 %v501_v62, %v500_v61 }
 0x1d6   :  { %v504_v0 = vsel %vm85_vm0, %v502_v63, %v1097_v1  ;;  %v1016_v1 = vld [vmem:[%s1429_s8 + $0x2] ss:$0 sm:$0xff] }
 0x1d7   :  { %579 = vmatmul.bf16.vlgmr.msrb.gmra.mxu2 %v504_v0  ;;  %v36_v63 = vld [vmem:[%s1435_s0] sm:$0xff]  ;;  %v1034_v0 = vmov 8.0   ;;  %s1035_s0 = smov 32  }
 0x25a   :  { %v580_v5 = vpop.f32.mrf.mxu2 }
 0x25b   :  { %v1385_v6 = vadd.f32 %v1016_v1, %v580_v5 }
 0x25d   :  { %v585_v9 = vmul.f32 %v1385_v6, %v1385_v6 }
 0x262   :  { %v582_v7 = vpop.f32.mrf.mxu2 }
 0x263   :  { %v1387_v8 = vadd.f32 %v1016_v1, %v582_v7 }
 0x265   :  { %v586_v10 = vmul.f32 %v1387_v8, %v1387_v8 }
 0x267   :  { %v587_v11 = vpack.c.bf16 %v586_v10, %v585_v9 }
 0x269   :  { %958 = vmatmul.msk.bf16.vlgmr.msra.gmra.mxu3 %vm85_vm0, %v587_v11 }
 0x2ec   :  { %v632_v13 = vpop.f32.mrf.mxu3 }
 0x2ed   :  { %v637_v14 = vmul.f32 %v632_v13, %v632_v13 }
 0x2ef   :  { %v639_v15 = vadd.f32 1e-16, %v637_v14  ;;  %v1017_v14 = vld [vmem:[%s1429_s8 + $0x3] ss:$0 sm:$0xff] }
 0x2f1   :  { %1018 = vrsqrt.f32 %v639_v15  ;;  %vm648_vm2 = vcmp.eq.f32.partialorder %v639_v15, inf  ;;  %v651_v29 = vand.u32 2147483648, %v639_v15  ;;  %vm650_vm3 = vcmp.eq.f32.partialorder %v639_v15, 0.0 }
 0x2f4   :  { %v634_v16 = vpop.f32.mrf.mxu3 }
 0x2f5   :  { %v638_v17 = vmul.f32 %v634_v16, %v634_v16 }
 0x2f7   :  { %v1019_v18 = vpop.eup %1018  ;;  %v640_v19 = vadd.f32 1e-16, %v638_v17 }
 0x2f8   :  { %v642_v20 = vmul.f32 %v1019_v18, %v639_v15 }
 0x2f9   :  { %1020 = vrsqrt.f32 %v640_v19  ;;  %vm660_vm4 = vcmp.eq.f32.partialorder %v640_v19, inf  ;;  %v663_v38 = vand.u32 2147483648, %v640_v19  ;;  %vm662_vm5 = vcmp.eq.f32.partialorder %v640_v19, 0.0 }
 0x2fa   :  { %v643_v21 = vmul.f32 %v1019_v18, %v642_v20 }
 0x2fc   :  { %v644_v22 = vmul.f32 0.5, %v643_v21 }
 0x2fe   :  { %v645_v23 = vsub.f32 1.5, %v644_v22 }
 0x2ff   :  { %v1021_v24 = vpop.eup %1020 }
 0x300   :  { %v654_v25 = vmul.f32 %v1021_v24, %v640_v19  ;;  %v646_v26 = vmul.f32 %v1019_v18, %v645_v23  ;;  %v708_v18 = vmul.f32 %v1017_v14, %v1385_v6  ;;  %v709_v23 = vmul.f32 %v1017_v14, %v1387_v8 }
 0x301   :  { %v141_v8 = vadd.f32 %v1334_v51, %v1397_v12 }
 0x302   :  { %v655_v27 = vmul.f32 %v1021_v24, %v654_v25  ;;  %v647_v28 = vmul.f32 %v646_v26, %v639_v15  ;;  %v719_v25 = vpop.permute.xlu0 %718 }
 0x304   :  { %v649_v30 = vsel %vm648_vm2, %v639_v15, %v647_v28  ;;  %v656_v31 = vmul.f32 0.5, %v655_v27  ;;  %v140_v27 = vadd.f32 %v1332_v50, %v36_v63  ;;  %v1015_v28 = vld [vmem:[%s1429_s8 + $0x1] ss:$0 sm:$0xff] }
 0x305   :  { %v652_v32 = vsel %vm650_vm3, %v651_v29, %v649_v30 }
 0x306   :  { %1022 = vrsqrt.f32 %v652_v32  ;;  %v657_v33 = vsub.f32 1.5, %v656_v31  ;;  %vm672_vm6 = vcmp.eq.f32.partialorder %v652_v32, inf  ;;  %v675_v49 = vand.u32 2147483648, %v652_v32 }
 0x307   :  { %vm674_vm8 = vcmp.eq.f32.partialorder %v652_v32, 0.0  ;;  %v143_v6 = vadd.f32 %v1015_v28, %v140_v27 }
 0x308   :  { %v658_v34 = vmul.f32 %v1021_v24, %v657_v33 }
 0x30a   :  { %v659_v35 = vmul.f32 %v658_v34, %v640_v19 }
 0x30c   :  { %v1023_v37 = vpop.eup %1022  ;;  %v661_v40 = vsel %vm660_vm4, %v640_v19, %v659_v35 }
 0x30d   :  { %v666_v39 = vmul.f32 %v1023_v37, %v652_v32  ;;  %v664_v41 = vsel %vm662_vm5, %v663_v38, %v661_v40 }
 0x30e   :  { %1024 = vrsqrt.f32 %v664_v41  ;;  %vm684_vm9 = vcmp.eq.f32.partialorder %v664_v41, inf  ;;  %v687_v36 = vand.u32 2147483648, %v664_v41  ;;  %vm686_vm10 = vcmp.eq.f32.partialorder %v664_v41, 0.0 }
 0x30f   :  { %v667_v42 = vmul.f32 %v1023_v37, %v666_v39  ;;  %1026 = vrcp.f32 %v1034_v0 }
 0x311   :  { %v668_v43 = vmul.f32 0.5, %v667_v42 }
 0x313   :  { %v669_v44 = vsub.f32 1.5, %v668_v43 }
 0x314   :  { %v1025_v45 = vpop.eup %1024 }
 0x315   :  { %v670_v46 = vmul.f32 %v1023_v37, %v669_v44  ;;  %v678_v47 = vmul.f32 %v1025_v45, %v664_v41  ;;  %v1027_v2 = vpop.eup %1026 }
 0x316   :  { %v697_v3 = vmul.f32 8.0, %v1027_v2  ;;  %vm701_vm11 = vweird.f32 %v1027_v2 }
 0x317   :  { %v671_v48 = vmul.f32 %v670_v46, %v652_v32  ;;  %v679_v52 = vmul.f32 %v1025_v45, %v678_v47 }
 0x318   :  { %v698_v4 = vsub.f32 1.0, %v697_v3 }
 0x319   :  { %v673_v53 = vsel %vm672_vm6, %v652_v32, %v671_v48  ;;  %v680_v55 = vmul.f32 0.5, %v679_v52  ;;  %v144_v32 = vadd.f32 %v1015_v28, %v141_v8 }
 0x31a   :  { %v676_v54 = vsel %vm674_vm8, %v675_v49, %v673_v53  ;;  %v699_v5 = vmul.f32 %v1027_v2, %v698_v4 }
 0x31b   :  { %v690_v56 = vsel %vm689_vm7, %v676_v54, 0.0  ;;  %v681_v57 = vsub.f32 1.5, %v680_v55 }
 0x31c   :  { %691 = vadd.xlane.f32.xlu1 %v690_v56  ;;  %v700_v1 = vadd.f32 %v1027_v2, %v699_v5 }
 0x31d   :  { %v682_v58 = vmul.f32 %v1025_v45, %v681_v57 }
 0x31e   :  { %v702_v7 = vsel %vm701_vm11, %v1027_v2, %v700_v1 }
 0x31f   :  { %v683_v59 = vmul.f32 %v682_v58, %v664_v41 }
 0x321   :  { %v685_v60 = vsel %vm684_vm9, %v664_v41, %v683_v59 }
 0x322   :  { %v688_v61 = vsel %vm686_vm10, %v687_v36, %v685_v60 }
 0x323   :  { %v693_v62 = vsel %vm689_vm7, %v688_v61, 0.0 }
 0x324   :  { %694 = vadd.xlane.f32.xlu2 %v693_v62 }
 0x33c   :  { %716 = vrot.lane.b32.xlu2 %v36_v63, %s1033_s29 }
 0x38f   :  { %v692_v9 = vpop.xlane.xlu1 %691 }
 0x390   :  { %v703_v10 = vmul.f32 %v702_v7, %v692_v9 }
 0x392   :  { %v705_v11 = vadd.f32 1e-06, %v703_v10 }
 0x394   :  { %1028 = vrcp.f32 %v705_v11 }
 0x397   :  { %v695_v13 = vpop.xlane.xlu2 %694 }
 0x398   :  { %v704_v15 = vmul.f32 %v702_v7, %v695_v13 }
 0x39a   :  { %v706_v16 = vadd.f32 1e-06, %v704_v15  ;;  %v1029_v17 = vpop.eup %1028 }
 0x39b   :  { %v712_v19 = vmul.f32 %v1029_v17, %v708_v18 }
 0x39c   :  { %1030 = vrcp.f32 %v706_v16 }
 0x39f   :  { %v717_v20 = vpop.permute.xlu2 %716 }
 0x3a0   :  { %v722_v21 = vadd.f32 %v717_v20, %v712_v19 }
 0x3a2   :  { %v1031_v22 = vpop.eup %1030  ;;  %726 = vrot.lane.b32.xlu0 %v722_v21, %s1035_s0 }
 0x3a3   :  { %v713_v24 = vmul.f32 %v1031_v22, %v709_v23 }
 0x3a5   :  { %v723_v26 = vadd.f32 %v719_v25, %v713_v24 }
 0x3aa   :  { %728 = vrot.lane.b32.xlu0 %v723_v26, %s1035_s0 }
 0x414   :  { %v727_v29 = vpop.permute.xlu0 %726 }
 0x415   :  { %v732_v30 = vsel %vm122_vm1, %v143_v6, %v727_v29 }
 0x416   :  { %v735_v31 = vsel %vm734_vm12, %v732_v30, 0.0 }
 0x417   :  { %737 = vst [vmem:[%s1436_s10] sm:$0xff] %v735_v31 }
 0x41c   :  { %v729_v33 = vpop.permute.xlu0 %728 }
 0x41d   :  { %v733_v50 = vsel %vm122_vm1, %v144_v32, %v729_v33 }
 0x41e   :  { %v736_v34 = vsel %vm734_vm12, %v733_v50, 0.0 }
 0x41f   :  { %738 = vst [vmem:[%s1436_s10 + $0x8] sm:$0xff] %v736_v34 }

</bundles_post_ra>
